<compile_context>
chip_gen: v6e
topology: v6e:2x2x1
jax: 0.10.0
libtpu: 0.0.40
codegen_flags: <defaults>
</compile_context>

<pallas_src>
import functools

import jax
import jax.numpy as jnp
import numpy as np
from jax.experimental import pallas as pl
from jax.experimental.pallas import tpu as pltpu

LN_EPS = 1e-5  # torch.nn.LayerNorm default eps


def _round_up(x, m):
    return (x + m - 1) // m * m


def _layernorm(x, g, b):
    mu = jnp.mean(x, axis=-1, keepdims=True)
    var = jnp.mean((x - mu) ** 2, axis=-1, keepdims=True)
    return (x - mu) * jax.lax.rsqrt(var + LN_EPS) * g + b


def saturn_kernel(
    # streamed / resident inputs
    expr_ref, pwt_ref, pw_ref, lib_ref,
    clg_ref, clb_ref,
    w1_ref, b1_ref, g1_ref, be1_ref,
    w2_ref, b2_ref, g2_ref, be2_ref,
    wd_ref, bd_ref, gd_ref, bed_ref,
    wc_ref, bc_ref, gc_ref, bec_ref,
    wdrop_ref, bdrop_ref,
    # outputs
    enc_in_ref, enc_ref, px_rate_ref, px_drop_ref,
    # VMEM scratch (persistent across the grid, per core)
    x_acc, c_scr, d_scr, m_scr, l_scr, scale_scr,
    *, gsp):
    p = pl.program_id(1)          # pass: 0 = gene reduction + MLP, 1 = softmax stats, 2 = emit
    t = pl.program_id(2)          # gene tile index
    nt = pl.num_programs(2)
    tg = pw_ref.shape[1]
    mxu = c_scr.dtype             # bf16 operand dtype for the MXU

    # ---------------- pass 0: gene-axis reduction + dense MLP chain ----------------
    @pl.when(p == 0)
    def _():
        @pl.when(t == 0)
        def _():
            x_acc[...] = jnp.zeros_like(x_acc)

        # bf16 x bf16 -> f32 accumulate on the MXU; pwt is pre-transposed so no
        # per-tile XLU transpose is needed.  Padded gene columns are zero (inert).
        x_acc[...] += jnp.dot(expr_ref[...], pwt_ref[...],
                              preferred_element_type=jnp.float32)

        @pl.when(t == nt - 1)
        def _():
            x = jnp.maximum(_layernorm(x_acc[...], clg_ref[...], clb_ref[...]), 0.0)
            # TODO(synk): dropout layers are stochastic; modeled as identity (eval mode).
            enc_in_ref[...] = x
            h = jnp.dot(x.astype(mxu), w1_ref[...],
                        preferred_element_type=jnp.float32) + b1_ref[...]
            h = jnp.maximum(_layernorm(h, g1_ref[...], be1_ref[...]), 0.0)
            e = jnp.dot(h.astype(mxu), w2_ref[...],
                        preferred_element_type=jnp.float32) + b2_ref[...]
            e = jnp.maximum(_layernorm(e, g2_ref[...], be2_ref[...]), 0.0)
            enc_ref[...] = e
            # px_decoder on hstack(encoded, one-hot species); one-hot folded into bd_ref.
            d = jnp.dot(e.astype(mxu), wd_ref[...],
                        preferred_element_type=jnp.float32) + bd_ref[...]
            d = jnp.maximum(_layernorm(d, gd_ref[...], bed_ref[...]), 0.0)
            d_scr[...] = d.astype(mxu)
            c = jnp.dot(d.astype(mxu), wc_ref[...],
                        preferred_element_type=jnp.float32) + bc_ref[...]
            c = jnp.maximum(_layernorm(c, gc_ref[...], bec_ref[...]), 0.0)
            c_scr[...] = c.astype(mxu)

    # ----------- pass 1: streaming softmax statistics over the gene axis -----------
    @pl.when(p == 1)
    def _():
        @pl.when(t == 0)
        def _():
            m_scr[...] = jnp.full(m_scr.shape, -1e30, dtype=m_scr.dtype)
            l_scr[...] = jnp.zeros_like(l_scr)

        s = jnp.dot(c_scr[...], pw_ref[...], preferred_element_type=jnp.float32)
        col = jax.lax.broadcasted_iota(jnp.int32, (1, tg), 1) + t * tg
        s = jnp.where(col < gsp, s, -1e30)              # ignore padded gene columns
        m_new = jnp.maximum(m_scr[...], jnp.max(s, axis=-1, keepdims=True))
        l_scr[...] = (l_scr[...] * jnp.exp(m_scr[...] - m_new)
                      + jnp.sum(jnp.exp(s - m_new), axis=-1, keepdims=True))
        m_scr[...] = m_new

        @pl.when(t == nt - 1)
        def _():
            # px_rate = sum(inp) * softmax(cl_to_px); the reference's exp(log(sum))
            # round trip is dropped.  Computed once per batch block.
            scale_scr[...] = lib_ref[...] / l_scr[...]

    # ---------------------- pass 2: emit px_rate / px_drop tiles -------------------
    @pl.when(p == 2)
    def _():
        s = jnp.dot(c_scr[...], pw_ref[...], preferred_element_type=jnp.float32)
        px_rate_ref[...] = jnp.exp(s - m_scr[...]) * scale_scr[...]
        px_drop_ref[...] = (jnp.dot(d_scr[...], wdrop_ref[...],
                                    preferred_element_type=jnp.float32)
                            + bdrop_ref[...])


def saturn_pallas_forward(params, inp, species, species_to_gene_idx, num_species,
                          *, gene_tile=None, batch_block=256, mxu_dtype=jnp.bfloat16):
    """Returns (encoder_input, encoded, mu, log_var, px_rate, px_r, px_drop)."""
    idx0, idx1 = species_to_gene_idx[species]
    gsp = idx1 - idx0
    b = inp.shape[0]
    num_cl = params["p_weights"].shape[0]
    hidden = params["w1"].shape[0]
    embed = params["w2"].shape[0]
    spec_idx = 0  # torch forward hardcodes spec_1h[:, 0] = 1.0
    f32 = jnp.float32

    # --- generation-aware defaults (v7x: 64 MiB VMEM / 2 TCs; v5e/v6e: 128 MiB) ---
    try:
        vmem_cap = int(pltpu.get_tpu_info().vmem_capacity_bytes)
    except Exception:
        vmem_cap = 128 * 1024 * 1024
    if gene_tile is None:
        gene_tile = 2048 if vmem_cap >= 96 * 1024 * 1024 else 1024

    # --- batch tiling: "parallel" leading grid axis (megacore on v7x) ---
    bp = _round_up(b, 8)
    bb = min(_round_up(batch_block, 8), bp)
    nb = pl.cdiv(bp, bb)
    bp = nb * bb

    # --- gene-axis tiling: lane-dense (multiple of 128) tiles, padded gene dim ---
    tg = min(_round_up(gene_tile, 128), _round_up(gsp, 128))
    gp = _round_up(gsp, tg)
    nt = gp // tg

    # --- glue: log1p / sum / exp / transpose / pad / bf16-cast (plain JAX) ---
    q = lambda a: a.astype(mxu_dtype)
    row = lambda v: v.reshape(1, -1).astype(f32)

    inp_f = inp.astype(f32)
    library = jnp.pad(jnp.sum(inp_f, axis=1, keepdims=True), ((0, bp - b), (0, 0)))
    expr = jnp.log(inp_f + 1.0)                                        # (b, gsp)
    expr = q(jnp.pad(expr, ((0, bp - b), (0, gp - gsp))))              # (bp, gp) bf16

    pw_exp = q(jnp.exp(params["p_weights"][:, idx0:idx1]))             # (num_cl, gsp) bf16
    pw_exp = jnp.pad(pw_exp, ((0, 0), (0, gp - gsp)))                  # (num_cl, gp)
    pw_exp_t = pw_exp.T                                                # (gp, num_cl), pass 0

    wdrop = q(jnp.pad(params["wdrop"].T, ((0, 0), (0, gp - gsp))))     # (hidden, gp) bf16
    bdrop = jnp.pad(row(params["bdrop"]), ((0, 0), (0, gp - gsp)))     # (1, gp) f32

    wd_full = params["wd"]                                   # (hidden, embed + num_species)
    wd_e = q(wd_full[:, :embed].T)                           # (embed, hidden) bf16
    # fold one-hot species into the bias (quantized like the reference's bf16 matmul)
    bd_eff = params["bd"] + wd_full[:, embed + spec_idx].astype(mxu_dtype).astype(f32)

    args = (
        expr, pw_exp_t, pw_exp, library,
        row(params["cl_g"]), row(params["cl_b"]),
        q(params["w1"].T), row(params["b1"]), row(params["g1"]), row(params["be1"]),
        q(params["w2"].T), row(params["b2"]), row(params["g2"]), row(params["be2"]),
        wd_e, row(bd_eff), row(params["gd"]), row(params["bed"]),
        q(params["wc"].T), row(params["bc"]), row(params["gc"]), row(params["bec"]),
        wdrop, bdrop,
    )

    # --- index maps: stream gene tiles only in the pass that needs them; park on the
    #     tile last visited (or first needed) so pass boundaries add no spurious DMAs.
    def expr_idx(bi, p, t):   return (bi, jnp.where(p == 0, t, nt - 1))
    def pwt_idx(bi, p, t):    return (jnp.where(p == 0, t, nt - 1), 0)
    def pw_idx(bi, p, t):     return (0, jnp.where(p == 0, 0, t))
    def lib_idx(bi, p, t):    return (bi, 0)
    def const_idx(bi, p, t):  return (0, 0)
    def p2_idx(bi, p, t):     return (0, jnp.where(p == 2, t, 0))
    def out_b_idx(bi, p, t):  return (bi, 0)
    def out_bt_idx(bi, p, t): return (bi, jnp.where(p == 2, t, 0))

    in_specs = (
        [pl.BlockSpec((bb, tg), expr_idx),
         pl.BlockSpec((tg, num_cl), pwt_idx),
         pl.BlockSpec((num_cl, tg), pw_idx),
         pl.BlockSpec((bb, 1), lib_idx)]
        + [pl.BlockSpec(a.shape, const_idx) for a in args[4:22]]
        + [pl.BlockSpec((hidden, tg), p2_idx),
           pl.BlockSpec((1, tg), p2_idx)]
    )

    out_shapes = (
        jax.ShapeDtypeStruct((bp, num_cl), f32),   # encoder_input
        jax.ShapeDtypeStruct((bp, embed), f32),    # encoded
        jax.ShapeDtypeStruct((bp, gp), f32),       # px_rate (padded)
        jax.ShapeDtypeStruct((bp, gp), f32),       # px_drop (padded)
    )
    out_specs = (
        pl.BlockSpec((bb, num_cl), out_b_idx),
        pl.BlockSpec((bb, embed), out_b_idx),
        pl.BlockSpec((bb, tg), out_bt_idx),
        pl.BlockSpec((bb, tg), out_bt_idx),
    )

    scratch_shapes = [
        pltpu.VMEM((bb, num_cl), f32),       # x accumulator (pass 0)
        pltpu.VMEM((bb, num_cl), mxu_dtype), # cl_scale (c), bf16 MXU operand
        pltpu.VMEM((bb, hidden), mxu_dtype), # decoded (d), bf16 MXU operand
        pltpu.VMEM((bb, 1), f32),            # softmax running max
        pltpu.VMEM((bb, 1), f32),            # softmax running sum
        pltpu.VMEM((bb, 1), f32),            # library / l  (pass-2 scale)
    ]

    # --- VMEM budget: accurate per-buffer estimate, 1.25x hedge, capped by generation ---
    def _bytes(shape, dtype):
        return int(np.prod(shape)) * jnp.dtype(dtype).itemsize

    streamed = 2 * (_bytes((bb, tg), mxu_dtype)        # expr
                    + _bytes((tg, num_cl), mxu_dtype)  # pw^T (pass 0)
                    + _bytes((num_cl, tg), mxu_dtype)  # pw   (passes 1-2)
                    + _bytes((bb, 1), f32)             # library
                    + _bytes((hidden, tg), mxu_dtype)  # wdrop
                    + _bytes((1, tg), f32)             # bdrop
                    + 2 * _bytes((bb, tg), f32))       # px_rate / px_drop blocks
    resident = 2 * (sum(_bytes(a.shape, a.dtype) for a in args[4:22])
                    + _bytes((bb, num_cl), f32) + _bytes((bb, embed), f32))
    scratch = (_bytes((bb, num_cl), f32) + _bytes((bb, num_cl), mxu_dtype)
               + _bytes((bb, hidden), mxu_dtype) + 3 * _bytes((bb, 1), f32))
    est = streamed + resident + scratch
    ceiling = int(0.625 * vmem_cap)                    # ~40 MiB on v7x, ~80 MiB on v5e/v6e
    vmem_limit = int(min(ceiling, max(16 * 1024 * 1024, int(1.25 * est))))

    enc_in, enc, px_rate, px_drop = pl.pallas_call(
        functools.partial(saturn_kernel, gsp=gsp),
        out_shape=out_shapes,
        grid_spec=pltpu.PrefetchScalarGridSpec(
            num_scalar_prefetch=0,
            grid=(nb, 3, nt),                  # (batch block, pass, gene tile)
            in_specs=in_specs,
            out_specs=out_specs,
            scratch_shapes=scratch_shapes,
        ),
        compiler_params=pltpu.CompilerParams(
            # batch blocks are independent (megacore-shardable on v7x);
            # pass / gene-tile axes are sequentially dependent.
            dimension_semantics=("parallel", "arbitrary", "arbitrary"),
            vmem_limit_bytes=vmem_limit,
        ),
    )(*args)

    px_r = jnp.exp(params["px_rs"])             # pure glue (one less in/out DMA)
    mu, log_var = None, None                    # vae=False path
    return (enc_in[:b], enc[:b], mu, log_var,
            px_rate[:b, :gsp], px_r, px_drop[:b, :gsp])


def reference_forward(params, inp, species, species_to_gene_idx, num_species,
                      num_genes, mxu_dtype=jnp.bfloat16):
    """Pure-JAX mirror of the PyTorch forward (eval mode).  The same intentional bf16
    operand quantization used by the kernel (exp(p_weights), expr, dense weights, the
    decoded activations) is applied here too, so the comparison isolates kernel
    correctness (tiling / accumulation / online softmax) from the bf16 storage cast."""
    hi = jax.lax.Precision.HIGHEST
    q = lambda a: a.astype(mxu_dtype).astype(jnp.float32)
    idx0, idx1 = species_to_gene_idx[species]
    b = inp.shape[0]
    expr = jnp.zeros((b, num_genes), jnp.float32).at[:, idx0:idx1].set(inp)
    expr = q(jnp.log(expr + 1.0))
    pwe = q(jnp.exp(params["p_weights"]))
    x = jnp.dot(expr, pwe.T, precision=hi)
    x = jnp.maximum(_layernorm(x, params["cl_g"], params["cl_b"]), 0.0)
    enc_in = x
    h = jnp.dot(q(x), q(params["w1"].T), precision=hi) + params["b1"]
    h = jnp.maximum(_layernorm(h, params["g1"], params["be1"]), 0.0)
    e = jnp.dot(q(h), q(params["w2"].T), precision=hi) + params["b2"]
    e = jnp.maximum(_layernorm(e, params["g2"], params["be2"]), 0.0)
    spec_1h = jnp.zeros((b, num_species), jnp.float32).at[:, 0].set(1.0)
    cat = jnp.concatenate([e, spec_1h], axis=1)
    d = jnp.dot(q(cat), q(params["wd"].T), precision=hi) + params["bd"]
    d = jnp.maximum(_layernorm(d, params["gd"], params["bed"]), 0.0)
    c = jnp.dot(q(d), q(params["wc"].T), precision=hi) + params["bc"]
    c = jnp.maximum(_layernorm(c, params["gc"], params["bec"]), 0.0)
    cl_to_px = jnp.dot(q(c), pwe, precision=hi)[:, idx0:idx1]
    px_scale = jax.nn.softmax(cl_to_px, axis=-1)
    library = jnp.log(jnp.sum(inp, axis=1, keepdims=True))
    px_rate = jnp.exp(library) * px_scale
    px_r = jnp.exp(params["px_rs"])
    px_drop = jnp.dot(q(d), q(params["wdrop"].T), precision=hi) + params["bdrop"]
    return enc_in, e, px_rate, px_r, px_drop


if __name__ == "__main__":
    # Small synthetic configuration.
    B = 8
    NUM_CL = 32          # gene_scores.shape[1]
    HIDDEN = 32
    EMBED = 16
    SPECIES_TO_GENE_IDX = {"human": (0, 24), "mouse": (24, 48)}
    NUM_GENES = 48
    NUM_SPECIES = len(SPECIES_TO_GENE_IDX)
    SPECIES = "human"
    I0, I1 = SPECIES_TO_GENE_IDX[SPECIES]
    GSP = I1 - I0

    keys = iter(jax.random.split(jax.random.PRNGKey(0), 40))

    def nrm(shape, scale=0.1):
        return scale * jax.random.normal(next(keys), shape, dtype=jnp.float32)

    # gene_scores > 0 (it is logged); p_weights = log(gene_scores.T)
    gene_scores = jax.random.uniform(next(keys), (NUM_GENES, NUM_CL),
                                     minval=0.5, maxval=1.5, dtype=jnp.float32)
    params = {
        "p_weights": jnp.log(gene_scores.T),                         # (NUM_CL, NUM_GENES)
        "cl_g": jnp.ones((NUM_CL,), jnp.float32) + nrm((NUM_CL,)),
        "cl_b": nrm((NUM_CL,)),
        # encoder block 1: Linear(NUM_CL -> HIDDEN) + LayerNorm
        "w1": nrm((HIDDEN, NUM_CL), 0.2), "b1": nrm((HIDDEN,)),
        "g1": jnp.ones((HIDDEN,), jnp.float32) + nrm((HIDDEN,)), "be1": nrm((HIDDEN,)),
        # encoder block 2: Linear(HIDDEN -> EMBED) + LayerNorm
        "w2": nrm((EMBED, HIDDEN), 0.2), "b2": nrm((EMBED,)),
        "g2": jnp.ones((EMBED,), jnp.float32) + nrm((EMBED,)), "be2": nrm((EMBED,)),
        # px_decoder: Linear(EMBED + NUM_SPECIES -> HIDDEN) + LayerNorm
        "wd": nrm((HIDDEN, EMBED + NUM_SPECIES), 0.2), "bd": nrm((HIDDEN,)),
        "gd": jnp.ones((HIDDEN,), jnp.float32) + nrm((HIDDEN,)), "bed": nrm((HIDDEN,)),
        # cl_scale_decoder: Linear(HIDDEN -> NUM_CL) + LayerNorm
        "wc": nrm((NUM_CL, HIDDEN), 0.2), "bc": nrm((NUM_CL,)),
        "gc": jnp.ones((NUM_CL,), jnp.float32) + nrm((NUM_CL,)), "bec": nrm((NUM_CL,)),
        # px_dropout_decoders[species]: Linear(HIDDEN -> GSP)
        "wdrop": nrm((GSP, HIDDEN), 0.2), "bdrop": nrm((GSP,)),
        # px_rs[species]
        "px_rs": jax.random.normal(next(keys), (GSP,), dtype=jnp.float32),
    }

    inp = jax.random.uniform(next(keys), (B, GSP), minval=0.0, maxval=2.0,
                             dtype=jnp.float32)

    outs = saturn_pallas_forward(params, inp, SPECIES, SPECIES_TO_GENE_IDX, NUM_SPECIES)
    outs = jax.block_until_ready(outs)
    enc_in, enc, mu, log_var, px_rate, px_r, px_drop = outs

    # Verify against the pure-JAX reference of the PyTorch forward.
    r_enc_in, r_enc, r_px_rate, r_px_r, r_px_drop = jax.block_until_ready(
        reference_forward(params, inp, SPECIES, SPECIES_TO_GENE_IDX,
                          NUM_SPECIES, NUM_GENES))
    for got, want in ((enc_in, r_enc_in), (enc, r_enc), (px_rate, r_px_rate),
                      (px_r, r_px_r), (px_drop, r_px_drop)):
        np.testing.assert_allclose(np.asarray(got), np.asarray(want),
                                   rtol=5e-3, atol=5e-3)

    print("KERNEL_OK")
</pallas_src>

<mosaic_0001>
module attributes {stable_mosaic.version = 11 : i64} {
  func.func @saturn_kernel(%arg0: i32, %arg1: i32, %arg2: i32, %arg3: memref<8x128xbf16, #tpu.memory_space<vmem>>, %arg4: memref<128x32xbf16, #tpu.memory_space<vmem>>, %arg5: memref<32x128xbf16, #tpu.memory_space<vmem>>, %arg6: memref<8x1xf32, #tpu.memory_space<vmem>>, %arg7: memref<1x32xf32, #tpu.memory_space<vmem>>, %arg8: memref<1x32xf32, #tpu.memory_space<vmem>>, %arg9: memref<32x32xbf16, #tpu.memory_space<vmem>>, %arg10: memref<1x32xf32, #tpu.memory_space<vmem>>, %arg11: memref<1x32xf32, #tpu.memory_space<vmem>>, %arg12: memref<1x32xf32, #tpu.memory_space<vmem>>, %arg13: memref<32x16xbf16, #tpu.memory_space<vmem>>, %arg14: memref<1x16xf32, #tpu.memory_space<vmem>>, %arg15: memref<1x16xf32, #tpu.memory_space<vmem>>, %arg16: memref<1x16xf32, #tpu.memory_space<vmem>>, %arg17: memref<16x32xbf16, #tpu.memory_space<vmem>>, %arg18: memref<1x32xf32, #tpu.memory_space<vmem>>, %arg19: memref<1x32xf32, #tpu.memory_space<vmem>>, %arg20: memref<1x32xf32, #tpu.memory_space<vmem>>, %arg21: memref<32x32xbf16, #tpu.memory_space<vmem>>, %arg22: memref<1x32xf32, #tpu.memory_space<vmem>>, %arg23: memref<1x32xf32, #tpu.memory_space<vmem>>, %arg24: memref<1x32xf32, #tpu.memory_space<vmem>>, %arg25: memref<32x128xbf16, #tpu.memory_space<vmem>>, %arg26: memref<1x128xf32, #tpu.memory_space<vmem>>, %arg27: memref<8x32xf32, #tpu.memory_space<vmem>>, %arg28: memref<8x16xf32, #tpu.memory_space<vmem>>, %arg29: memref<8x128xf32, #tpu.memory_space<vmem>>, %arg30: memref<8x128xf32, #tpu.memory_space<vmem>>, %arg31: memref<8x32xf32, #tpu.memory_space<vmem>>, %arg32: memref<8x32xbf16, #tpu.memory_space<vmem>>, %arg33: memref<8x32xbf16, #tpu.memory_space<vmem>>, %arg34: memref<8x1xf32, #tpu.memory_space<vmem>>, %arg35: memref<8x1xf32, #tpu.memory_space<vmem>>, %arg36: memref<8x1xf32, #tpu.memory_space<vmem>>) attributes {dimension_semantics = [#tpu.dimension_semantics<parallel>, #tpu.dimension_semantics<arbitrary>, #tpu.dimension_semantics<arbitrary>], iteration_bounds = array<i64: 1, 3, 1>, scalar_prefetch = 0 : i64, scratch_operands = 6 : i64, tpu.core_type = #tpu.core_type<tc>, window_params = [{transform_indices = @transform_0, window_bounds = array<i64: 8, 128>}, {transform_indices = @transform_1, window_bounds = array<i64: 128, 32>}, {transform_indices = @transform_2, window_bounds = array<i64: 32, 128>}, {transform_indices = @transform_3, window_bounds = array<i64: 8, 1>}, {pipeline_mode = #tpu.pipeline_mode<synchronous>, transform_indices = @transform_4, window_bounds = array<i64: 1, 32>}, {pipeline_mode = #tpu.pipeline_mode<synchronous>, transform_indices = @transform_5, window_bounds = array<i64: 1, 32>}, {pipeline_mode = #tpu.pipeline_mode<synchronous>, transform_indices = @transform_6, window_bounds = array<i64: 32, 32>}, {pipeline_mode = #tpu.pipeline_mode<synchronous>, transform_indices = @transform_7, window_bounds = array<i64: 1, 32>}, {pipeline_mode = #tpu.pipeline_mode<synchronous>, transform_indices = @transform_8, window_bounds = array<i64: 1, 32>}, {pipeline_mode = #tpu.pipeline_mode<synchronous>, transform_indices = @transform_9, window_bounds = array<i64: 1, 32>}, {pipeline_mode = #tpu.pipeline_mode<synchronous>, transform_indices = @transform_10, window_bounds = array<i64: 32, 16>}, {pipeline_mode = #tpu.pipeline_mode<synchronous>, transform_indices = @transform_11, window_bounds = array<i64: 1, 16>}, {pipeline_mode = #tpu.pipeline_mode<synchronous>, transform_indices = @transform_12, window_bounds = array<i64: 1, 16>}, {pipeline_mode = #tpu.pipeline_mode<synchronous>, transform_indices = @transform_13, window_bounds = array<i64: 1, 16>}, {pipeline_mode = #tpu.pipeline_mode<synchronous>, transform_indices = @transform_14, window_bounds = array<i64: 16, 32>}, {pipeline_mode = #tpu.pipeline_mode<synchronous>, transform_indices = @transform_15, window_bounds = array<i64: 1, 32>}, {pipeline_mode = #tpu.pipeline_mode<synchronous>, transform_indices = @transform_16, window_bounds = array<i64: 1, 32>}, {pipeline_mode = #tpu.pipeline_mode<synchronous>, transform_indices = @transform_17, window_bounds = array<i64: 1, 32>}, {pipeline_mode = #tpu.pipeline_mode<synchronous>, transform_indices = @transform_18, window_bounds = array<i64: 32, 32>}, {pipeline_mode = #tpu.pipeline_mode<synchronous>, transform_indices = @transform_19, window_bounds = array<i64: 1, 32>}, {pipeline_mode = #tpu.pipeline_mode<synchronous>, transform_indices = @transform_20, window_bounds = array<i64: 1, 32>}, {pipeline_mode = #tpu.pipeline_mode<synchronous>, transform_indices = @transform_21, window_bounds = array<i64: 1, 32>}, {transform_indices = @transform_22, window_bounds = array<i64: 32, 128>}, {transform_indices = @transform_23, window_bounds = array<i64: 1, 128>}, {transform_indices = @transform_24, window_bounds = array<i64: 8, 32>}, {transform_indices = @transform_25, window_bounds = array<i64: 8, 16>}, {transform_indices = @transform_26, window_bounds = array<i64: 8, 128>}, {transform_indices = @transform_27, window_bounds = array<i64: 8, 128>}]} {
    %c0_i32 = arith.constant 0 : i32
    %0 = arith.cmpi eq, %arg1, %c0_i32 : i32
    %1 = arith.extui %0 : i1 to i32
    %c0_i32_0 = arith.constant 0 : i32
    %2 = arith.cmpi ne, %1, %c0_i32_0 : i32
    scf.if %2 {
      %c0_i32_3 = arith.constant 0 : i32
      %9 = arith.cmpi eq, %arg2, %c0_i32_3 : i32
      %10 = arith.extui %9 : i1 to i32
      %c0_i32_4 = arith.constant 0 : i32
      %11 = arith.cmpi ne, %10, %c0_i32_4 : i32
      scf.if %11 {
        %cst_14 = arith.constant 0.000000e+00 : f32
        %21 = vector.broadcast %cst_14 : f32 to vector<8x32xf32>
        %c0_15 = arith.constant 0 : index
        %c0_16 = arith.constant 0 : index
        %22 = vector.load %arg31[%c0_15, %c0_16] : memref<8x32xf32, #tpu.memory_space<vmem>>, vector<8x32xf32>
        tpu.vector_store %arg31[%c0_15, %c0_16], %21 {strides = array<i32>} : memref<8x32xf32, #tpu.memory_space<vmem>>, vector<8x32xf32>,
      } else {
      }
      %c0 = arith.constant 0 : index
      %c0_5 = arith.constant 0 : index
      %12 = vector.load %arg31[%c0, %c0_5] : memref<8x32xf32, #tpu.memory_space<vmem>>, vector<8x32xf32>
      %c0_6 = arith.constant 0 : index
      %c0_7 = arith.constant 0 : index
      %13 = vector.load %arg3[%c0_6, %c0_7] : memref<8x128xbf16, #tpu.memory_space<vmem>>, vector<8x128xbf16>
      %c0_8 = arith.constant 0 : index
      %c0_9 = arith.constant 0 : index
      %14 = vector.load %arg4[%c0_8, %c0_9] : memref<128x32xbf16, #tpu.memory_space<vmem>>, vector<128x32xbf16>
      %cst = arith.constant dense<0.000000e+00> : vector<8x32xf32>
      %15 = tpu.matmul %13, %14, %cst {dimension_numbers = #tpu.dot_dimension_numbers<[1], [0], [0], [1], [0, 0, 1, 1], [], []>} : vector<8x128xbf16>, vector<128x32xbf16>, vector<8x32xf32> -> vector<8x32xf32>
      %16 = arith.addf %12, %15 : vector<8x32xf32>
      %c0_10 = arith.constant 0 : index
      %c0_11 = arith.constant 0 : index
      %17 = vector.load %arg31[%c0_10, %c0_11] : memref<8x32xf32, #tpu.memory_space<vmem>>, vector<8x32xf32>
      tpu.vector_store %arg31[%c0_10, %c0_11], %16 {strides = array<i32>} : memref<8x32xf32, #tpu.memory_space<vmem>>, vector<8x32xf32>,
      %c0_i32_12 = arith.constant 0 : i32
      %18 = arith.cmpi eq, %arg2, %c0_i32_12 : i32
      %19 = arith.extui %18 : i1 to i32
      %c0_i32_13 = arith.constant 0 : i32
      %20 = arith.cmpi ne, %19, %c0_i32_13 : i32
      scf.if %20 {
        %c0_14 = arith.constant 0 : index
        %c0_15 = arith.constant 0 : index
        %21 = vector.load %arg31[%c0_14, %c0_15] : memref<8x32xf32, #tpu.memory_space<vmem>>, vector<8x32xf32>
        %c0_16 = arith.constant 0 : index
        %c0_17 = arith.constant 0 : index
        %22 = vector.load %arg7[%c0_16, %c0_17] : memref<1x32xf32, #tpu.memory_space<vmem>>, vector<1x32xf32>
        %c0_18 = arith.constant 0 : index
        %c0_19 = arith.constant 0 : index
        %23 = vector.load %arg8[%c0_18, %c0_19] : memref<1x32xf32, #tpu.memory_space<vmem>>, vector<1x32xf32>
        %cst_20 = arith.constant dense<0.000000e+00> : vector<8xf32>
        %24 = vector.multi_reduction <add>, %21, %cst_20 [1] : vector<8x32xf32> to vector<8xf32>
        %25 = vector.shape_cast %24 : vector<8xf32> to vector<8x1xf32>
        %cst_21 = arith.constant 3.200000e+01 : f32
        %26 = vector.broadcast %cst_21 : f32 to vector<8x1xf32>
        %27 = arith.divf %25, %26 : vector<8x1xf32>
        %28 = vector.broadcast %27 : vector<8x1xf32> to vector<8x32xf32>
        %29 = arith.subf %21, %28 : vector<8x32xf32>
        %30 = arith.mulf %29, %29 : vector<8x32xf32>
        %cst_22 = arith.constant dense<0.000000e+00> : vector<8xf32>
        %31 = vector.multi_reduction <add>, %30, %cst_22 [1] : vector<8x32xf32> to vector<8xf32>
        %32 = vector.shape_cast %31 : vector<8xf32> to vector<8x1xf32>
        %cst_23 = arith.constant 3.200000e+01 : f32
        %33 = vector.broadcast %cst_23 : f32 to vector<8x1xf32>
        %34 = arith.divf %32, %33 : vector<8x1xf32>
        %35 = vector.broadcast %27 : vector<8x1xf32> to vector<8x32xf32>
        %36 = arith.subf %21, %35 : vector<8x32xf32>
        %cst_24 = arith.constant 9.99999974E-6 : f32
        %37 = vector.broadcast %cst_24 : f32 to vector<8x1xf32>
        %38 = arith.addf %34, %37 : vector<8x1xf32>
        %39 = math.rsqrt %38 : vector<8x1xf32>
        %40 = vector.broadcast %39 : vector<8x1xf32> to vector<8x32xf32>
        %41 = arith.mulf %36, %40 : vector<8x32xf32>
        %42 = vector.broadcast %22 : vector<1x32xf32> to vector<8x32xf32>
        %43 = arith.mulf %41, %42 : vector<8x32xf32>
        %44 = vector.broadcast %23 : vector<1x32xf32> to vector<8x32xf32>
        %45 = arith.addf %43, %44 : vector<8x32xf32>
        %cst_25 = arith.constant 0.000000e+00 : f32
        %46 = vector.broadcast %cst_25 : f32 to vector<8x32xf32>
        %47 = arith.maximumf %45, %46 : vector<8x32xf32>
        %c0_26 = arith.constant 0 : index
        %c0_27 = arith.constant 0 : index
        %48 = vector.load %arg27[%c0_26, %c0_27] : memref<8x32xf32, #tpu.memory_space<vmem>>, vector<8x32xf32>
        tpu.vector_store %arg27[%c0_26, %c0_27], %47 {strides = array<i32>} : memref<8x32xf32, #tpu.memory_space<vmem>>, vector<8x32xf32>,
        %49 = arith.truncf %47 : vector<8x32xf32> to vector<8x32xbf16>
        %c0_28 = arith.constant 0 : index
        %c0_29 = arith.constant 0 : index
        %50 = vector.load %arg9[%c0_28, %c0_29] : memref<32x32xbf16, #tpu.memory_space<vmem>>, vector<32x32xbf16>
        %cst_30 = arith.constant dense<0.000000e+00> : vector<8x32xf32>
        %51 = tpu.matmul %49, %50, %cst_30 {dimension_numbers = #tpu.dot_dimension_numbers<[1], [0], [0], [1], [0, 0, 1, 1], [], []>} : vector<8x32xbf16>, vector<32x32xbf16>, vector<8x32xf32> -> vector<8x32xf32>
        %c0_31 = arith.constant 0 : index
        %c0_32 = arith.constant 0 : index
        %52 = vector.load %arg10[%c0_31, %c0_32] : memref<1x32xf32, #tpu.memory_space<vmem>>, vector<1x32xf32>
        %53 = vector.broadcast %52 : vector<1x32xf32> to vector<8x32xf32>
        %54 = arith.addf %51, %53 : vector<8x32xf32>
        %c0_33 = arith.constant 0 : index
        %c0_34 = arith.constant 0 : index
        %55 = vector.load %arg11[%c0_33, %c0_34] : memref<1x32xf32, #tpu.memory_space<vmem>>, vector<1x32xf32>
        %c0_35 = arith.constant 0 : index
        %c0_36 = arith.constant 0 : index
        %56 = vector.load %arg12[%c0_35, %c0_36] : memref<1x32xf32, #tpu.memory_space<vmem>>, vector<1x32xf32>
        %cst_37 = arith.constant dense<0.000000e+00> : vector<8xf32>
        %57 = vector.multi_reduction <add>, %54, %cst_37 [1] : vector<8x32xf32> to vector<8xf32>
        %58 = vector.shape_cast %57 : vector<8xf32> to vector<8x1xf32>
        %cst_38 = arith.constant 3.200000e+01 : f32
        %59 = vector.broadcast %cst_38 : f32 to vector<8x1xf32>
        %60 = arith.divf %58, %59 : vector<8x1xf32>
        %61 = vector.broadcast %60 : vector<8x1xf32> to vector<8x32xf32>
        %62 = arith.subf %54, %61 : vector<8x32xf32>
        %63 = arith.mulf %62, %62 : vector<8x32xf32>
        %cst_39 = arith.constant dense<0.000000e+00> : vector<8xf32>
        %64 = vector.multi_reduction <add>, %63, %cst_39 [1] : vector<8x32xf32> to vector<8xf32>
        %65 = vector.shape_cast %64 : vector<8xf32> to vector<8x1xf32>
        %cst_40 = arith.constant 3.200000e+01 : f32
        %66 = vector.broadcast %cst_40 : f32 to vector<8x1xf32>
        %67 = arith.divf %65, %66 : vector<8x1xf32>
        %68 = vector.broadcast %60 : vector<8x1xf32> to vector<8x32xf32>
        %69 = arith.subf %54, %68 : vector<8x32xf32>
        %cst_41 = arith.constant 9.99999974E-6 : f32
        %70 = vector.broadcast %cst_41 : f32 to vector<8x1xf32>
        %71 = arith.addf %67, %70 : vector<8x1xf32>
        %72 = math.rsqrt %71 : vector<8x1xf32>
        %73 = vector.broadcast %72 : vector<8x1xf32> to vector<8x32xf32>
        %74 = arith.mulf %69, %73 : vector<8x32xf32>
        %75 = vector.broadcast %55 : vector<1x32xf32> to vector<8x32xf32>
        %76 = arith.mulf %74, %75 : vector<8x32xf32>
        %77 = vector.broadcast %56 : vector<1x32xf32> to vector<8x32xf32>
        %78 = arith.addf %76, %77 : vector<8x32xf32>
        %cst_42 = arith.constant 0.000000e+00 : f32
        %79 = vector.broadcast %cst_42 : f32 to vector<8x32xf32>
        %80 = arith.maximumf %78, %79 : vector<8x32xf32>
        %81 = arith.truncf %80 : vector<8x32xf32> to vector<8x32xbf16>
        %c0_43 = arith.constant 0 : index
        %c0_44 = arith.constant 0 : index
        %82 = vector.load %arg13[%c0_43, %c0_44] : memref<32x16xbf16, #tpu.memory_space<vmem>>, vector<32x16xbf16>
        %cst_45 = arith.constant dense<0.000000e+00> : vector<8x16xf32>
        %83 = tpu.matmul %81, %82, %cst_45 {dimension_numbers = #tpu.dot_dimension_numbers<[1], [0], [0], [1], [0, 0, 1, 1], [], []>} : vector<8x32xbf16>, vector<32x16xbf16>, vector<8x16xf32> -> vector<8x16xf32>
        %c0_46 = arith.constant 0 : index
        %c0_47 = arith.constant 0 : index
        %84 = vector.load %arg14[%c0_46, %c0_47] : memref<1x16xf32, #tpu.memory_space<vmem>>, vector<1x16xf32>
        %85 = vector.broadcast %84 : vector<1x16xf32> to vector<8x16xf32>
        %86 = arith.addf %83, %85 : vector<8x16xf32>
        %c0_48 = arith.constant 0 : index
        %c0_49 = arith.constant 0 : index
        %87 = vector.load %arg15[%c0_48, %c0_49] : memref<1x16xf32, #tpu.memory_space<vmem>>, vector<1x16xf32>
        %c0_50 = arith.constant 0 : index
        %c0_51 = arith.constant 0 : index
        %88 = vector.load %arg16[%c0_50, %c0_51] : memref<1x16xf32, #tpu.memory_space<vmem>>, vector<1x16xf32>
        %cst_52 = arith.constant dense<0.000000e+00> : vector<8xf32>
        %89 = vector.multi_reduction <add>, %86, %cst_52 [1] : vector<8x16xf32> to vector<8xf32>
        %90 = vector.shape_cast %89 : vector<8xf32> to vector<8x1xf32>
        %cst_53 = arith.constant 1.600000e+01 : f32
        %91 = vector.broadcast %cst_53 : f32 to vector<8x1xf32>
        %92 = arith.divf %90, %91 : vector<8x1xf32>
        %93 = vector.broadcast %92 : vector<8x1xf32> to vector<8x16xf32>
        %94 = arith.subf %86, %93 : vector<8x16xf32>
        %95 = arith.mulf %94, %94 : vector<8x16xf32>
        %cst_54 = arith.constant dense<0.000000e+00> : vector<8xf32>
        %96 = vector.multi_reduction <add>, %95, %cst_54 [1] : vector<8x16xf32> to vector<8xf32>
        %97 = vector.shape_cast %96 : vector<8xf32> to vector<8x1xf32>
        %cst_55 = arith.constant 1.600000e+01 : f32
        %98 = vector.broadcast %cst_55 : f32 to vector<8x1xf32>
        %99 = arith.divf %97, %98 : vector<8x1xf32>
        %100 = vector.broadcast %92 : vector<8x1xf32> to vector<8x16xf32>
        %101 = arith.subf %86, %100 : vector<8x16xf32>
        %cst_56 = arith.constant 9.99999974E-6 : f32
        %102 = vector.broadcast %cst_56 : f32 to vector<8x1xf32>
        %103 = arith.addf %99, %102 : vector<8x1xf32>
        %104 = math.rsqrt %103 : vector<8x1xf32>
        %105 = vector.broadcast %104 : vector<8x1xf32> to vector<8x16xf32>
        %106 = arith.mulf %101, %105 : vector<8x16xf32>
        %107 = vector.broadcast %87 : vector<1x16xf32> to vector<8x16xf32>
        %108 = arith.mulf %106, %107 : vector<8x16xf32>
        %109 = vector.broadcast %88 : vector<1x16xf32> to vector<8x16xf32>
        %110 = arith.addf %108, %109 : vector<8x16xf32>
        %cst_57 = arith.constant 0.000000e+00 : f32
        %111 = vector.broadcast %cst_57 : f32 to vector<8x16xf32>
        %112 = arith.maximumf %110, %111 : vector<8x16xf32>
        %c0_58 = arith.constant 0 : index
        %c0_59 = arith.constant 0 : index
        %113 = vector.load %arg28[%c0_58, %c0_59] : memref<8x16xf32, #tpu.memory_space<vmem>>, vector<8x16xf32>
        tpu.vector_store %arg28[%c0_58, %c0_59], %112 {strides = array<i32>} : memref<8x16xf32, #tpu.memory_space<vmem>>, vector<8x16xf32>,
        %114 = arith.truncf %112 : vector<8x16xf32> to vector<8x16xbf16>
        %c0_60 = arith.constant 0 : index
        %c0_61 = arith.constant 0 : index
        %115 = vector.load %arg17[%c0_60, %c0_61] : memref<16x32xbf16, #tpu.memory_space<vmem>>, vector<16x32xbf16>
        %cst_62 = arith.constant dense<0.000000e+00> : vector<8x32xf32>
        %116 = tpu.matmul %114, %115, %cst_62 {dimension_numbers = #tpu.dot_dimension_numbers<[1], [0], [0], [1], [0, 0, 1, 1], [], []>} : vector<8x16xbf16>, vector<16x32xbf16>, vector<8x32xf32> -> vector<8x32xf32>
        %c0_63 = arith.constant 0 : index
        %c0_64 = arith.constant 0 : index
        %117 = vector.load %arg18[%c0_63, %c0_64] : memref<1x32xf32, #tpu.memory_space<vmem>>, vector<1x32xf32>
        %118 = vector.broadcast %117 : vector<1x32xf32> to vector<8x32xf32>
        %119 = arith.addf %116, %118 : vector<8x32xf32>
        %c0_65 = arith.constant 0 : index
        %c0_66 = arith.constant 0 : index
        %120 = vector.load %arg19[%c0_65, %c0_66] : memref<1x32xf32, #tpu.memory_space<vmem>>, vector<1x32xf32>
        %c0_67 = arith.constant 0 : index
        %c0_68 = arith.constant 0 : index
        %121 = vector.load %arg20[%c0_67, %c0_68] : memref<1x32xf32, #tpu.memory_space<vmem>>, vector<1x32xf32>
        %cst_69 = arith.constant dense<0.000000e+00> : vector<8xf32>
        %122 = vector.multi_reduction <add>, %119, %cst_69 [1] : vector<8x32xf32> to vector<8xf32>
        %123 = vector.shape_cast %122 : vector<8xf32> to vector<8x1xf32>
        %cst_70 = arith.constant 3.200000e+01 : f32
        %124 = vector.broadcast %cst_70 : f32 to vector<8x1xf32>
        %125 = arith.divf %123, %124 : vector<8x1xf32>
        %126 = vector.broadcast %125 : vector<8x1xf32> to vector<8x32xf32>
        %127 = arith.subf %119, %126 : vector<8x32xf32>
        %128 = arith.mulf %127, %127 : vector<8x32xf32>
        %cst_71 = arith.constant dense<0.000000e+00> : vector<8xf32>
        %129 = vector.multi_reduction <add>, %128, %cst_71 [1] : vector<8x32xf32> to vector<8xf32>
        %130 = vector.shape_cast %129 : vector<8xf32> to vector<8x1xf32>
        %cst_72 = arith.constant 3.200000e+01 : f32
        %131 = vector.broadcast %cst_72 : f32 to vector<8x1xf32>
        %132 = arith.divf %130, %131 : vector<8x1xf32>
        %133 = vector.broadcast %125 : vector<8x1xf32> to vector<8x32xf32>
        %134 = arith.subf %119, %133 : vector<8x32xf32>
        %cst_73 = arith.constant 9.99999974E-6 : f32
        %135 = vector.broadcast %cst_73 : f32 to vector<8x1xf32>
        %136 = arith.addf %132, %135 : vector<8x1xf32>
        %137 = math.rsqrt %136 : vector<8x1xf32>
        %138 = vector.broadcast %137 : vector<8x1xf32> to vector<8x32xf32>
        %139 = arith.mulf %134, %138 : vector<8x32xf32>
        %140 = vector.broadcast %120 : vector<1x32xf32> to vector<8x32xf32>
        %141 = arith.mulf %139, %140 : vector<8x32xf32>
        %142 = vector.broadcast %121 : vector<1x32xf32> to vector<8x32xf32>
        %143 = arith.addf %141, %142 : vector<8x32xf32>
        %cst_74 = arith.constant 0.000000e+00 : f32
        %144 = vector.broadcast %cst_74 : f32 to vector<8x32xf32>
        %145 = arith.maximumf %143, %144 : vector<8x32xf32>
        %146 = arith.truncf %145 : vector<8x32xf32> to vector<8x32xbf16>
        %c0_75 = arith.constant 0 : index
        %c0_76 = arith.constant 0 : index
        %147 = vector.load %arg33[%c0_75, %c0_76] : memref<8x32xbf16, #tpu.memory_space<vmem>>, vector<8x32xbf16>
        tpu.vector_store %arg33[%c0_75, %c0_76], %146 {strides = array<i32>} : memref<8x32xbf16, #tpu.memory_space<vmem>>, vector<8x32xbf16>,
        %148 = arith.truncf %145 : vector<8x32xf32> to vector<8x32xbf16>
        %c0_77 = arith.constant 0 : index
        %c0_78 = arith.constant 0 : index
        %149 = vector.load %arg21[%c0_77, %c0_78] : memref<32x32xbf16, #tpu.memory_space<vmem>>, vector<32x32xbf16>
        %cst_79 = arith.constant dense<0.000000e+00> : vector<8x32xf32>
        %150 = tpu.matmul %148, %149, %cst_79 {dimension_numbers = #tpu.dot_dimension_numbers<[1], [0], [0], [1], [0, 0, 1, 1], [], []>} : vector<8x32xbf16>, vector<32x32xbf16>, vector<8x32xf32> -> vector<8x32xf32>
        %c0_80 = arith.constant 0 : index
        %c0_81 = arith.constant 0 : index
        %151 = vector.load %arg22[%c0_80, %c0_81] : memref<1x32xf32, #tpu.memory_space<vmem>>, vector<1x32xf32>
        %152 = vector.broadcast %151 : vector<1x32xf32> to vector<8x32xf32>
        %153 = arith.addf %150, %152 : vector<8x32xf32>
        %c0_82 = arith.constant 0 : index
        %c0_83 = arith.constant 0 : index
        %154 = vector.load %arg23[%c0_82, %c0_83] : memref<1x32xf32, #tpu.memory_space<vmem>>, vector<1x32xf32>
        %c0_84 = arith.constant 0 : index
        %c0_85 = arith.constant 0 : index
        %155 = vector.load %arg24[%c0_84, %c0_85] : memref<1x32xf32, #tpu.memory_space<vmem>>, vector<1x32xf32>
        %cst_86 = arith.constant dense<0.000000e+00> : vector<8xf32>
        %156 = vector.multi_reduction <add>, %153, %cst_86 [1] : vector<8x32xf32> to vector<8xf32>
        %157 = vector.shape_cast %156 : vector<8xf32> to vector<8x1xf32>
        %cst_87 = arith.constant 3.200000e+01 : f32
        %158 = vector.broadcast %cst_87 : f32 to vector<8x1xf32>
        %159 = arith.divf %157, %158 : vector<8x1xf32>
        %160 = vector.broadcast %159 : vector<8x1xf32> to vector<8x32xf32>
        %161 = arith.subf %153, %160 : vector<8x32xf32>
        %162 = arith.mulf %161, %161 : vector<8x32xf32>
        %cst_88 = arith.constant dense<0.000000e+00> : vector<8xf32>
        %163 = vector.multi_reduction <add>, %162, %cst_88 [1] : vector<8x32xf32> to vector<8xf32>
        %164 = vector.shape_cast %163 : vector<8xf32> to vector<8x1xf32>
        %cst_89 = arith.constant 3.200000e+01 : f32
        %165 = vector.broadcast %cst_89 : f32 to vector<8x1xf32>
        %166 = arith.divf %164, %165 : vector<8x1xf32>
        %167 = vector.broadcast %159 : vector<8x1xf32> to vector<8x32xf32>
        %168 = arith.subf %153, %167 : vector<8x32xf32>
        %cst_90 = arith.constant 9.99999974E-6 : f32
        %169 = vector.broadcast %cst_90 : f32 to vector<8x1xf32>
        %170 = arith.addf %166, %169 : vector<8x1xf32>
        %171 = math.rsqrt %170 : vector<8x1xf32>
        %172 = vector.broadcast %171 : vector<8x1xf32> to vector<8x32xf32>
        %173 = arith.mulf %168, %172 : vector<8x32xf32>
        %174 = vector.broadcast %154 : vector<1x32xf32> to vector<8x32xf32>
        %175 = arith.mulf %173, %174 : vector<8x32xf32>
        %176 = vector.broadcast %155 : vector<1x32xf32> to vector<8x32xf32>
        %177 = arith.addf %175, %176 : vector<8x32xf32>
        %cst_91 = arith.constant 0.000000e+00 : f32
        %178 = vector.broadcast %cst_91 : f32 to vector<8x32xf32>
        %179 = arith.maximumf %177, %178 : vector<8x32xf32>
        %180 = arith.truncf %179 : vector<8x32xf32> to vector<8x32xbf16>
        %c0_92 = arith.constant 0 : index
        %c0_93 = arith.constant 0 : index
        %181 = vector.load %arg32[%c0_92, %c0_93] : memref<8x32xbf16, #tpu.memory_space<vmem>>, vector<8x32xbf16>
        tpu.vector_store %arg32[%c0_92, %c0_93], %180 {strides = array<i32>} : memref<8x32xbf16, #tpu.memory_space<vmem>>, vector<8x32xbf16>,
      } else {
      }
    } else {
    }
    %c1_i32 = arith.constant 1 : i32
    %3 = arith.cmpi eq, %arg1, %c1_i32 : i32
    %4 = arith.extui %3 : i1 to i32
    %c0_i32_1 = arith.constant 0 : i32
    %5 = arith.cmpi ne, %4, %c0_i32_1 : i32
    scf.if %5 {
      %c0_i32_3 = arith.constant 0 : i32
      %9 = arith.cmpi eq, %arg2, %c0_i32_3 : i32
      %10 = arith.extui %9 : i1 to i32
      %c0_i32_4 = arith.constant 0 : i32
      %11 = arith.cmpi ne, %10, %c0_i32_4 : i32
      scf.if %11 {
        %cst_23 = arith.constant -1.000000e+30 : f32
        %45 = vector.broadcast %cst_23 : f32 to vector<8x1xf32>
        %c0_24 = arith.constant 0 : index
        %c0_25 = arith.constant 0 : index
        %46 = vector.load %arg34[%c0_24, %c0_25] : memref<8x1xf32, #tpu.memory_space<vmem>>, vector<8x1xf32>
        tpu.vector_store %arg34[%c0_24, %c0_25], %45 {strides = array<i32>} : memref<8x1xf32, #tpu.memory_space<vmem>>, vector<8x1xf32>,
        %cst_26 = arith.constant 0.000000e+00 : f32
        %47 = vector.broadcast %cst_26 : f32 to vector<8x1xf32>
        %c0_27 = arith.constant 0 : index
        %c0_28 = arith.constant 0 : index
        %48 = vector.load %arg35[%c0_27, %c0_28] : memref<8x1xf32, #tpu.memory_space<vmem>>, vector<8x1xf32>
        tpu.vector_store %arg35[%c0_27, %c0_28], %47 {strides = array<i32>} : memref<8x1xf32, #tpu.memory_space<vmem>>, vector<8x1xf32>,
      } else {
      }
      %c0 = arith.constant 0 : index
      %c0_5 = arith.constant 0 : index
      %12 = vector.load %arg32[%c0, %c0_5] : memref<8x32xbf16, #tpu.memory_space<vmem>>, vector<8x32xbf16>
      %c0_6 = arith.constant 0 : index
      %c0_7 = arith.constant 0 : index
      %13 = vector.load %arg5[%c0_6, %c0_7] : memref<32x128xbf16, #tpu.memory_space<vmem>>, vector<32x128xbf16>
      %cst = arith.constant dense<0.000000e+00> : vector<8x128xf32>
      %14 = tpu.matmul %12, %13, %cst {dimension_numbers = #tpu.dot_dimension_numbers<[1], [0], [0], [1], [0, 0, 1, 1], [], []>} : vector<8x32xbf16>, vector<32x128xbf16>, vector<8x128xf32> -> vector<8x128xf32>
      %15 = tpu.iota {dimensions = array<i32: 1>} : vector<1x128xi32>
      %c128_i32 = arith.constant 128 : i32
      %16 = arith.muli %arg2, %c128_i32 : i32
      %17 = vector.broadcast %16 : i32 to vector<1x128xi32>
      %18 = arith.addi %15, %17 : vector<1x128xi32>
      %c24_i32 = arith.constant 24 : i32
      %19 = vector.broadcast %c24_i32 : i32 to vector<1x128xi32>
      %20 = arith.cmpi slt, %18, %19 : vector<1x128xi32>
      %cst_8 = arith.constant -1.000000e+30 : f32
      %21 = vector.shape_cast %20 : vector<1x128xi1> to vector<1x128xi1>
      %22 = vector.broadcast %21 : vector<1x128xi1> to vector<8x128xi1>
      %23 = vector.broadcast %cst_8 : f32 to vector<8x128xf32>
      %24 = arith.select %22, %14, %23 : vector<8x128xi1>, vector<8x128xf32>
      %c0_9 = arith.constant 0 : index
      %c0_10 = arith.constant 0 : index
      %25 = vector.load %arg34[%c0_9, %c0_10] : memref<8x1xf32, #tpu.memory_space<vmem>>, vector<8x1xf32>
      %cst_11 = arith.constant dense<0xFF800000> : vector<8xf32>
      %26 = vector.multi_reduction <maximumf>, %24, %cst_11 [1] : vector<8x128xf32> to vector<8xf32>
      %27 = vector.shape_cast %26 : vector<8xf32> to vector<8x1xf32>
      %28 = arith.maximumf %25, %27 : vector<8x1xf32>
      %c0_12 = arith.constant 0 : index
      %c0_13 = arith.constant 0 : index
      %29 = vector.load %arg35[%c0_12, %c0_13] : memref<8x1xf32, #tpu.memory_space<vmem>>, vector<8x1xf32>
      %c0_14 = arith.constant 0 : index
      %c0_15 = arith.constant 0 : index
      %30 = vector.load %arg34[%c0_14, %c0_15] : memref<8x1xf32, #tpu.memory_space<vmem>>, vector<8x1xf32>
      %31 = arith.subf %30, %28 : vector<8x1xf32>
      %32 = math.exp %31 : vector<8x1xf32>
      %33 = arith.mulf %29, %32 : vector<8x1xf32>
      %34 = vector.broadcast %28 : vector<8x1xf32> to vector<8x128xf32>
      %35 = arith.subf %24, %34 : vector<8x128xf32>
      %36 = math.exp %35 : vector<8x128xf32>
      %cst_16 = arith.constant dense<0.000000e+00> : vector<8xf32>
      %37 = vector.multi_reduction <add>, %36, %cst_16 [1] : vector<8x128xf32> to vector<8xf32>
      %38 = vector.shape_cast %37 : vector<8xf32> to vector<8x1xf32>
      %39 = arith.addf %33, %38 : vector<8x1xf32>
      %c0_17 = arith.constant 0 : index
      %c0_18 = arith.constant 0 : index
      %40 = vector.load %arg35[%c0_17, %c0_18] : memref<8x1xf32, #tpu.memory_space<vmem>>, vector<8x1xf32>
      tpu.vector_store %arg35[%c0_17, %c0_18], %39 {strides = array<i32>} : memref<8x1xf32, #tpu.memory_space<vmem>>, vector<8x1xf32>,
      %c0_19 = arith.constant 0 : index
      %c0_20 = arith.constant 0 : index
      %41 = vector.load %arg34[%c0_19, %c0_20] : memref<8x1xf32, #tpu.memory_space<vmem>>, vector<8x1xf32>
      tpu.vector_store %arg34[%c0_19, %c0_20], %28 {strides = array<i32>} : memref<8x1xf32, #tpu.memory_space<vmem>>, vector<8x1xf32>,
      %c0_i32_21 = arith.constant 0 : i32
      %42 = arith.cmpi eq, %arg2, %c0_i32_21 : i32
      %43 = arith.extui %42 : i1 to i32
      %c0_i32_22 = arith.constant 0 : i32
      %44 = arith.cmpi ne, %43, %c0_i32_22 : i32
      scf.if %44 {
        %c0_23 = arith.constant 0 : index
        %c0_24 = arith.constant 0 : index
        %45 = vector.load %arg6[%c0_23, %c0_24] : memref<8x1xf32, #tpu.memory_space<vmem>>, vector<8x1xf32>
        %c0_25 = arith.constant 0 : index
        %c0_26 = arith.constant 0 : index
        %46 = vector.load %arg35[%c0_25, %c0_26] : memref<8x1xf32, #tpu.memory_space<vmem>>, vector<8x1xf32>
        %47 = arith.divf %45, %46 : vector<8x1xf32>
        %c0_27 = arith.constant 0 : index
        %c0_28 = arith.constant 0 : index
        %48 = vector.load %arg36[%c0_27, %c0_28] : memref<8x1xf32, #tpu.memory_space<vmem>>, vector<8x1xf32>
        tpu.vector_store %arg36[%c0_27, %c0_28], %47 {strides = array<i32>} : memref<8x1xf32, #tpu.memory_space<vmem>>, vector<8x1xf32>,
      } else {
      }
    } else {
    }
    %c2_i32 = arith.constant 2 : i32
    %6 = arith.cmpi eq, %arg1, %c2_i32 : i32
    %7 = arith.extui %6 : i1 to i32
    %c0_i32_2 = arith.constant 0 : i32
    %8 = arith.cmpi ne, %7, %c0_i32_2 : i32
    scf.if %8 {
      %c0 = arith.constant 0 : index
      %c0_3 = arith.constant 0 : index
      %9 = vector.load %arg32[%c0, %c0_3] : memref<8x32xbf16, #tpu.memory_space<vmem>>, vector<8x32xbf16>
      %c0_4 = arith.constant 0 : index
      %c0_5 = arith.constant 0 : index
      %10 = vector.load %arg5[%c0_4, %c0_5] : memref<32x128xbf16, #tpu.memory_space<vmem>>, vector<32x128xbf16>
      %cst = arith.constant dense<0.000000e+00> : vector<8x128xf32>
      %11 = tpu.matmul %9, %10, %cst {dimension_numbers = #tpu.dot_dimension_numbers<[1], [0], [0], [1], [0, 0, 1, 1], [], []>} : vector<8x32xbf16>, vector<32x128xbf16>, vector<8x128xf32> -> vector<8x128xf32>
      %c0_6 = arith.constant 0 : index
      %c0_7 = arith.constant 0 : index
      %12 = vector.load %arg34[%c0_6, %c0_7] : memref<8x1xf32, #tpu.memory_space<vmem>>, vector<8x1xf32>
      %13 = vector.broadcast %12 : vector<8x1xf32> to vector<8x128xf32>
      %14 = arith.subf %11, %13 : vector<8x128xf32>
      %15 = math.exp %14 : vector<8x128xf32>
      %c0_8 = arith.constant 0 : index
      %c0_9 = arith.constant 0 : index
      %16 = vector.load %arg36[%c0_8, %c0_9] : memref<8x1xf32, #tpu.memory_space<vmem>>, vector<8x1xf32>
      %17 = vector.broadcast %16 : vector<8x1xf32> to vector<8x128xf32>
      %18 = arith.mulf %15, %17 : vector<8x128xf32>
      %c0_10 = arith.constant 0 : index
      %c0_11 = arith.constant 0 : index
      %19 = vector.load %arg29[%c0_10, %c0_11] : memref<8x128xf32, #tpu.memory_space<vmem>>, vector<8x128xf32>
      tpu.vector_store %arg29[%c0_10, %c0_11], %18 {strides = array<i32>} : memref<8x128xf32, #tpu.memory_space<vmem>>, vector<8x128xf32>,
      %c0_12 = arith.constant 0 : index
      %c0_13 = arith.constant 0 : index
      %20 = vector.load %arg33[%c0_12, %c0_13] : memref<8x32xbf16, #tpu.memory_space<vmem>>, vector<8x32xbf16>
      %c0_14 = arith.constant 0 : index
      %c0_15 = arith.constant 0 : index
      %21 = vector.load %arg25[%c0_14, %c0_15] : memref<32x128xbf16, #tpu.memory_space<vmem>>, vector<32x128xbf16>
      %cst_16 = arith.constant dense<0.000000e+00> : vector<8x128xf32>
      %22 = tpu.matmul %20, %21, %cst_16 {dimension_numbers = #tpu.dot_dimension_numbers<[1], [0], [0], [1], [0, 0, 1, 1], [], []>} : vector<8x32xbf16>, vector<32x128xbf16>, vector<8x128xf32> -> vector<8x128xf32>
      %c0_17 = arith.constant 0 : index
      %c0_18 = arith.constant 0 : index
      %23 = vector.load %arg26[%c0_17, %c0_18] : memref<1x128xf32, #tpu.memory_space<vmem>>, vector<1x128xf32>
      %24 = vector.broadcast %23 : vector<1x128xf32> to vector<8x128xf32>
      %25 = arith.addf %22, %24 : vector<8x128xf32>
      %c0_19 = arith.constant 0 : index
      %c0_20 = arith.constant 0 : index
      %26 = vector.load %arg30[%c0_19, %c0_20] : memref<8x128xf32, #tpu.memory_space<vmem>>, vector<8x128xf32>
      tpu.vector_store %arg30[%c0_19, %c0_20], %25 {strides = array<i32>} : memref<8x128xf32, #tpu.memory_space<vmem>>, vector<8x128xf32>,
    } else {
    }
    return
  }
  func.func @transform_0(%arg0: i32, %arg1: i32, %arg2: i32) -> (i32, i32) {
    %c0_i32 = arith.constant 0 : i32
    %0 = arith.cmpi eq, %arg1, %c0_i32 : i32
    %c0_i32_0 = arith.constant 0 : i32
    %1 = arith.select %0, %arg2, %c0_i32_0 : i32
    %c0_i32_1 = arith.constant 0 : i32
    return %arg0, %1 : i32, i32
  }
  func.func @transform_1(%arg0: i32, %arg1: i32, %arg2: i32) -> (i32, i32) {
    %c0_i32 = arith.constant 0 : i32
    %0 = arith.cmpi eq, %arg1, %c0_i32 : i32
    %c0_i32_0 = arith.constant 0 : i32
    %1 = arith.select %0, %arg2, %c0_i32_0 : i32
    %c0_i32_1 = arith.constant 0 : i32
    %c0_i32_2 = arith.constant 0 : i32
    return %1, %c0_i32_1 : i32, i32
  }
  func.func @transform_2(%arg0: i32, %arg1: i32, %arg2: i32) -> (i32, i32) {
    %c0_i32 = arith.constant 0 : i32
    %0 = arith.cmpi eq, %arg1, %c0_i32 : i32
    %c0_i32_0 = arith.constant 0 : i32
    %1 = arith.select %0, %c0_i32_0, %arg2 : i32
    %c0_i32_1 = arith.constant 0 : i32
    %c0_i32_2 = arith.constant 0 : i32
    return %c0_i32_1, %1 : i32, i32
  }
  func.func @transform_3(%arg0: i32, %arg1: i32, %arg2: i32) -> (i32, i32) {
    %c0_i32 = arith.constant 0 : i32
    %c0_i32_0 = arith.constant 0 : i32
    return %arg0, %c0_i32 : i32, i32
  }
  func.func @transform_4(%arg0: i32, %arg1: i32, %arg2: i32) -> (i32, i32) {
    %c0_i32 = arith.constant 0 : i32
    %c0_i32_0 = arith.constant 0 : i32
    %c0_i32_1 = arith.constant 0 : i32
    return %c0_i32, %c0_i32_0 : i32, i32
  }
  func.func @transform_5(%arg0: i32, %arg1: i32, %arg2: i32) -> (i32, i32) {
    %c0_i32 = arith.constant 0 : i32
    %c0_i32_0 = arith.constant 0 : i32
    %c0_i32_1 = arith.constant 0 : i32
    return %c0_i32, %c0_i32_0 : i32, i32
  }
  func.func @transform_6(%arg0: i32, %arg1: i32, %arg2: i32) -> (i32, i32) {
    %c0_i32 = arith.constant 0 : i32
    %c0_i32_0 = arith.constant 0 : i32
    %c0_i32_1 = arith.constant 0 : i32
    return %c0_i32, %c0_i32_0 : i32, i32
  }
  func.func @transform_7(%arg0: i32, %arg1: i32, %arg2: i32) -> (i32, i32) {
    %c0_i32 = arith.constant 0 : i32
    %c0_i32_0 = arith.constant 0 : i32
    %c0_i32_1 = arith.constant 0 : i32
    return %c0_i32, %c0_i32_0 : i32, i32
  }
  func.func @transform_8(%arg0: i32, %arg1: i32, %arg2: i32) -> (i32, i32) {
    %c0_i32 = arith.constant 0 : i32
    %c0_i32_0 = arith.constant 0 : i32
    %c0_i32_1 = arith.constant 0 : i32
    return %c0_i32, %c0_i32_0 : i32, i32
  }
  func.func @transform_9(%arg0: i32, %arg1: i32, %arg2: i32) -> (i32, i32) {
    %c0_i32 = arith.constant 0 : i32
    %c0_i32_0 = arith.constant 0 : i32
    %c0_i32_1 = arith.constant 0 : i32
    return %c0_i32, %c0_i32_0 : i32, i32
  }
  func.func @transform_10(%arg0: i32, %arg1: i32, %arg2: i32) -> (i32, i32) {
    %c0_i32 = arith.constant 0 : i32
    %c0_i32_0 = arith.constant 0 : i32
    %c0_i32_1 = arith.constant 0 : i32
    return %c0_i32, %c0_i32_0 : i32, i32
  }
  func.func @transform_11(%arg0: i32, %arg1: i32, %arg2: i32) -> (i32, i32) {
    %c0_i32 = arith.constant 0 : i32
    %c0_i32_0 = arith.constant 0 : i32
    %c0_i32_1 = arith.constant 0 : i32
    return %c0_i32, %c0_i32_0 : i32, i32
  }
  func.func @transform_12(%arg0: i32, %arg1: i32, %arg2: i32) -> (i32, i32) {
    %c0_i32 = arith.constant 0 : i32
    %c0_i32_0 = arith.constant 0 : i32
    %c0_i32_1 = arith.constant 0 : i32
    return %c0_i32, %c0_i32_0 : i32, i32
  }
  func.func @transform_13(%arg0: i32, %arg1: i32, %arg2: i32) -> (i32, i32) {
    %c0_i32 = arith.constant 0 : i32
    %c0_i32_0 = arith.constant 0 : i32
    %c0_i32_1 = arith.constant 0 : i32
    return %c0_i32, %c0_i32_0 : i32, i32
  }
  func.func @transform_14(%arg0: i32, %arg1: i32, %arg2: i32) -> (i32, i32) {
    %c0_i32 = arith.constant 0 : i32
    %c0_i32_0 = arith.constant 0 : i32
    %c0_i32_1 = arith.constant 0 : i32
    return %c0_i32, %c0_i32_0 : i32, i32
  }
  func.func @transform_15(%arg0: i32, %arg1: i32, %arg2: i32) -> (i32, i32) {
    %c0_i32 = arith.constant 0 : i32
    %c0_i32_0 = arith.constant 0 : i32
    %c0_i32_1 = arith.constant 0 : i32
    return %c0_i32, %c0_i32_0 : i32, i32
  }
  func.func @transform_16(%arg0: i32, %arg1: i32, %arg2: i32) -> (i32, i32) {
    %c0_i32 = arith.constant 0 : i32
    %c0_i32_0 = arith.constant 0 : i32
    %c0_i32_1 = arith.constant 0 : i32
    return %c0_i32, %c0_i32_0 : i32, i32
  }
  func.func @transform_17(%arg0: i32, %arg1: i32, %arg2: i32) -> (i32, i32) {
    %c0_i32 = arith.constant 0 : i32
    %c0_i32_0 = arith.constant 0 : i32
    %c0_i32_1 = arith.constant 0 : i32
    return %c0_i32, %c0_i32_0 : i32, i32
  }
  func.func @transform_18(%arg0: i32, %arg1: i32, %arg2: i32) -> (i32, i32) {
    %c0_i32 = arith.constant 0 : i32
    %c0_i32_0 = arith.constant 0 : i32
    %c0_i32_1 = arith.constant 0 : i32
    return %c0_i32, %c0_i32_0 : i32, i32
  }
  func.func @transform_19(%arg0: i32, %arg1: i32, %arg2: i32) -> (i32, i32) {
    %c0_i32 = arith.constant 0 : i32
    %c0_i32_0 = arith.constant 0 : i32
    %c0_i32_1 = arith.constant 0 : i32
    return %c0_i32, %c0_i32_0 : i32, i32
  }
  func.func @transform_20(%arg0: i32, %arg1: i32, %arg2: i32) -> (i32, i32) {
    %c0_i32 = arith.constant 0 : i32
    %c0_i32_0 = arith.constant 0 : i32
    %c0_i32_1 = arith.constant 0 : i32
    return %c0_i32, %c0_i32_0 : i32, i32
  }
  func.func @transform_21(%arg0: i32, %arg1: i32, %arg2: i32) -> (i32, i32) {
    %c0_i32 = arith.constant 0 : i32
    %c0_i32_0 = arith.constant 0 : i32
    %c0_i32_1 = arith.constant 0 : i32
    return %c0_i32, %c0_i32_0 : i32, i32
  }
  func.func @transform_22(%arg0: i32, %arg1: i32, %arg2: i32) -> (i32, i32) {
    %c2_i32 = arith.constant 2 : i32
    %0 = arith.cmpi eq, %arg1, %c2_i32 : i32
    %c0_i32 = arith.constant 0 : i32
    %1 = arith.select %0, %arg2, %c0_i32 : i32
    %c0_i32_0 = arith.constant 0 : i32
    %c0_i32_1 = arith.constant 0 : i32
    return %c0_i32_0, %1 : i32, i32
  }
  func.func @transform_23(%arg0: i32, %arg1: i32, %arg2: i32) -> (i32, i32) {
    %c2_i32 = arith.constant 2 : i32
    %0 = arith.cmpi eq, %arg1, %c2_i32 : i32
    %c0_i32 = arith.constant 0 : i32
    %1 = arith.select %0, %arg2, %c0_i32 : i32
    %c0_i32_0 = arith.constant 0 : i32
    %c0_i32_1 = arith.constant 0 : i32
    return %c0_i32_0, %1 : i32, i32
  }
  func.func @transform_24(%arg0: i32, %arg1: i32, %arg2: i32) -> (i32, i32) {
    %c0_i32 = arith.constant 0 : i32
    %c0_i32_0 = arith.constant 0 : i32
    return %arg0, %c0_i32 : i32, i32
  }
  func.func @transform_25(%arg0: i32, %arg1: i32, %arg2: i32) -> (i32, i32) {
    %c0_i32 = arith.constant 0 : i32
    %c0_i32_0 = arith.constant 0 : i32
    return %arg0, %c0_i32 : i32, i32
  }
  func.func @transform_26(%arg0: i32, %arg1: i32, %arg2: i32) -> (i32, i32) {
    %c2_i32 = arith.constant 2 : i32
    %0 = arith.cmpi eq, %arg1, %c2_i32 : i32
    %c0_i32 = arith.constant 0 : i32
    %1 = arith.select %0, %arg2, %c0_i32 : i32
    %c0_i32_0 = arith.constant 0 : i32
    return %arg0, %1 : i32, i32
  }
  func.func @transform_27(%arg0: i32, %arg1: i32, %arg2: i32) -> (i32, i32) {
    %c2_i32 = arith.constant 2 : i32
    %0 = arith.cmpi eq, %arg1, %c2_i32 : i32
    %c0_i32 = arith.constant 0 : i32
    %1 = arith.select %0, %arg2, %c0_i32 : i32
    %c0_i32_0 = arith.constant 0 : i32
    return %arg0, %1 : i32, i32
  }
}

</mosaic_0001>

<bundles_post_ra>
// kernel: tpu_custom_call.1
= control target key start
LH: loop header
LB: loop body
LE: loop exit
PB: predicated region body
PF: predicated region fallthrough
CT: control target
= control target key end

     0   :  { %s2906_s0 = inlined_call_operand.vmem [shape: bf16[8,128], index: 0, kind: input, shape index: {}]   ;;  %s2907_s1 = inlined_call_operand.vmem [shape: bf16[128,32], index: 1, kind: input, shape index: {}]   ;;  %s2908_s2 = inlined_call_operand.vmem [shape: bf16[32,128], index: 2, kind: input, shape index: {}]   ;;  %s2909_s3 = inlined_call_operand.vmem [shape: f32[8,1], index: 3, kind: input, shape index: {}]   ;;  %s2910_s4 = inlined_call_operand.vmem [shape: f32[1,32], index: 4, kind: input, shape index: {}]   ;;  %s2911_s5 = inlined_call_operand.vmem [shape: f32[1,32], index: 5, kind: input, shape index: {}]   ;;  %s2912_s6 = inlined_call_operand.vmem [shape: bf16[32,32], index: 6, kind: input, shape index: {}]   ;;  %s2913_s7 = inlined_call_operand.vmem [shape: f32[1,32], index: 7, kind: input, shape index: {}]   ;;  %s2914_s8 = inlined_call_operand.vmem [shape: f32[1,32], index: 8, kind: input, shape index: {}]   ;;  %s2915_s9 = inlined_call_operand.vmem [shape: f32[1,32], index: 9, kind: input, shape index: {}]   ;;  %s2916_s10 = inlined_call_operand.vmem [shape: bf16[32,16], index: 10, kind: input, shape index: {}]   ;;  %s2917_s11 = inlined_call_operand.vmem [shape: f32[1,16], index: 11, kind: input, shape index: {}]   ;;  %s2918_s12 = inlined_call_operand.vmem [shape: f32[1,16], index: 12, kind: input, shape index: {}]   ;;  %s2919_s13 = inlined_call_operand.vmem [shape: f32[1,16], index: 13, kind: input, shape index: {}]   ;;  %s2920_s14 = inlined_call_operand.vmem [shape: bf16[16,32], index: 14, kind: input, shape index: {}]   ;;  %s2921_s15 = inlined_call_operand.vmem [shape: f32[1,32], index: 15, kind: input, shape index: {}]   ;;  %s2922_s16 = inlined_call_operand.vmem [shape: f32[1,32], index: 16, kind: input, shape index: {}]   ;;  %s2923_s17 = inlined_call_operand.vmem [shape: f32[1,32], index: 17, kind: input, shape index: {}]   ;;  %s2924_s18 = inlined_call_operand.vmem [shape: bf16[32,32], index: 18, kind: input, shape index: {}]   ;;  %s2925_s19 = inlined_call_operand.vmem [shape: f32[1,32], index: 19, kind: input, shape index: {}]   ;;  %s2926_s20 = inlined_call_operand.vmem [shape: f32[1,32], index: 20, kind: input, shape index: {}]   ;;  %s2927_s21 = inlined_call_operand.vmem [shape: f32[1,32], index: 21, kind: input, shape index: {}]   ;;  %s2928_s22 = inlined_call_operand.vmem [shape: bf16[32,128], index: 22, kind: input, shape index: {}]   ;;  %s2929_s23 = inlined_call_operand.vmem [shape: f32[1,128], index: 23, kind: input, shape index: {}]   ;;  %s2930_s24 = inlined_call_operand.hbm [shape: f32[8,32], index: 24, kind: output, shape index: {0}]   ;;  %s2931_s25 = inlined_call_operand.hbm [shape: f32[8,16], index: 25, kind: output, shape index: {1}]   ;;  %s2932_s26 = inlined_call_operand.hbm [shape: f32[8,128], index: 26, kind: output, shape index: {2}]   ;;  %s2933_s27 = inlined_call_operand.hbm [shape: f32[8,128], index: 27, kind: output, shape index: {3}]  }
   0x1   :  { %2941 = sst [smem:[#allocation17_spill]] %s2906_s0 }
   0x2   :  { %2942 = sst [smem:[#allocation18_spill]] %s2907_s1 }
   0x3   :  { %2943 = sst [smem:[#allocation19_spill]] %s2908_s2 }
   0x4   :  { %2944 = sst [smem:[#allocation20_spill]] %s2909_s3 }
   0x5   :  { %2945 = sst [smem:[#allocation21_spill]] %s2910_s4 }
   0x6   :  { %2946 = sst [smem:[#allocation22_spill]] %s2911_s5 }
   0x7   :  { %2947 = sst [smem:[#allocation23_spill]] %s2912_s6 }
   0x8   :  { %2948 = sst [smem:[#allocation24_spill]] %s2913_s7 }
   0x9   :  { %2949 = sst [smem:[#allocation25_spill]] %s2914_s8 }
   0xa   :  { %2950 = sst [smem:[#allocation26_spill]] %s2915_s9 }
   0xb   :  { %2951 = sst [smem:[#allocation27_spill]] %s2916_s10 }
   0xc   :  { %2952 = sst [smem:[#allocation28_spill]] %s2917_s11 }
   0xd   :  { %2953 = sst [smem:[#allocation29_spill]] %s2918_s12 }
   0xe   :  { %33 = vsyncpa [#allocation9], 0 }
   0xf   :  { %34 = vsyncpa [#allocation11], 0  ;;  %s2651_s7 = smov 0   ;;  %s2653_s4 = smov 0  }
  0x10   :  { %s2655_s8 = smov 0  }
  0x11 LB: > { %s55_s5 = sadd.s32 1, %s2492_s4  ;;  %p2096_p0 = scmp.ge.s32.totalorder %s2496_s8, 1  ;;  %s2496_s8 = sphi %s2655_s8, %s40_s8   ;;  %s2492_s4 = sphi %s2653_s4, %s2974_s4   ;;  %s2488_s7 = sphi %s2651_s7, %s2973_s7  }
  0x12   : > { %p57_p1 = scmp.ge.s32.totalorder %s55_s5, 3  ;;  %p867_p2 = scmp.lt.s32.totalorder %s2496_s8, 4 }
  0x14   : > { %s2976_s5 = smov (%p57_p1, %s55_s5), 0  ;;  %p868_p3 = pnand %p2096_p0, %p867_p2 }
  0x15   : > { %p2097_p4 = scmp.ne.s32.totalorder (!%p868_p3), %s2488_s7, 0 }
  0x16   : > { %871 = sbr.rel (%p868_p3) target bundleno = 3551 (0xddf), region = 116 }
  0x1b   : > { %1032 = sbr.rel (%p2097_p4) target bundleno = 2609 (0xa31), region = 120  ;;  %s2954_s10 = sld [smem:[#allocation18_spill]] (!%p2097_p4) }
  0x1c   : > { %s2955_s29 = sld [smem:[#allocation17_spill]] (!%p2097_p4) }
  0x1d   : > { %s2956_s11 = sld [smem:[#allocation23_spill]] (!%p2097_p4) }
  0x1e   : > { %s2958_s9 = sld [smem:[#allocation22_spill]] (!%p2097_p4) }
  0x1f   : > { %s2959_s28 = sld [smem:[#allocation24_spill]] (!%p2097_p4) }
  0x20   : > { %v2498_v1 = vmov 0.0   ;;  %vm2499_vm0 = vmmov 0   ;;  %vm1037_vm1 = vcmask 261120   ;;  %s2962_s30 = sld [smem:[#allocation26_spill]]  ;;  %vm1350_vm2 = vcmask 130048  }
  0x21   : > { %v2325_v0 = vld [vmem:[%s2954_s10 + $0x38] sm:$0xff]   ;;  %2182 = vmatprep.subr.bf16.mxu0 %v2498_v1  ;;  %2202 = vmatprep.subr.bf16.mxu1 %v2498_v1  ;;  %v2326_v2 = vld [vmem:[%s2954_s10 + $0x30] sm:$0xff]   ;;  %1038 = vst.msk [vmem:[#allocation2] sm:$0xff] %vm1037_vm1, %v2498_v1  ;;  %v2327_v3 = vld [vmem:[%s2954_s10 + $0x28] sm:$0xff]   ;;  %s2964_s12 = sld [smem:[#allocation29_spill]]  ;;  %vm1471_vm3 = vcmask 257024  }
  0x22   : > { %2183 = vmatpush3.bf16.msra.mxu0 %v2325_v0  ;;  %2198 = vmatprep.mubr.msk.bf16.mxu0 %vm2499_vm0, %v2498_v1  ;;  %v2328_v4 = vld [vmem:[%s2954_s10 + $0x20] sm:$0xff]   ;;  %v2329_v5 = vld [vmem:[%s2954_s10 + $0x18] sm:$0xff]   ;;  %v2330_v6 = vld [vmem:[%s2954_s10 + $0x10] sm:$0xff]  }
  0x23   : > { %2184 = vmatprep.subr.bf16.mxu0 %v2498_v1  ;;  %2206 = vmatprep.mubr.msk.bf16.mxu1 %vm2499_vm0, %v2498_v1  ;;  %v2331_v7 = vld [vmem:[%s2954_s10 + $0x8] sm:$0xff]   ;;  %v2332_v8 = vld [vmem:[%s2954_s10] sm:$0xff]   ;;  %s2963_s10 = sld [smem:[#allocation28_spill]] }
  0x24   : > { %v1040_v9 = vld [vmem:[%s2955_s29] sm:$0xf]  ;;  %v2333_v23 = vld [vmem:[%s2956_s11 + $0x8] sm:$0xff]   ;;  %s2957_s29 = sld [smem:[#allocation21_spill]] }
  0x25   : > { %2203 = vmatpush3.bf16.msra.mxu1 %v2333_v23  ;;  %v2334_v24 = vld [vmem:[%s2956_s11] sm:$0xff]  }
  0x26   : > { %2185 = vmatpush3.bf16.msra.mxu0 %v2326_v2  ;;  %2204 = vmatprep.subr.bf16.mxu1 %v2498_v1  ;;  %v2107_v31 = vld [vmem:[%s2958_s9] ss:$0 sm:$0xff] }
  0x27   : > { %2186 = vmatprep.subr.bf16.mxu0 %v2498_v1  ;;  %v2108_v36 = vld [vmem:[%s2959_s28] ss:$0 sm:$0xff]  ;;  %s2961_s28 = sld [smem:[#allocation25_spill]] }
  0x28   : > { %v1039_v10 = vld [vmem:[#allocation2] sm:$0xff] }
  0x29   : > { %2205 = vmatpush3.bf16.msra.mxu1 %v2334_v24  ;;  %v2113_v56 = vld [vmem:[%s2962_s30] ss:$0 sm:$0xff] }
  0x2a   : > { %2187 = vmatpush3.bf16.msra.mxu0 %v2327_v3  ;;  %2210 = vmatprep.subr.bf16.mxu1 %v2498_v1  ;;  %v2106_v29 = vld [vmem:[%s2957_s29] ss:$0 sm:$0xff]  ;;  %s2960_s29 = sld [smem:[#allocation27_spill]] }
  0x2b   : > { %2188 = vmatprep.subr.bf16.mxu0 %v2498_v1  ;;  %v2114_v61 = vld [vmem:[%s2963_s10] ss:$0 sm:$0xff] }
  0x2d   : > { %v2112_v54 = vld [vmem:[%s2961_s28] ss:$0 sm:$0xff] }
  0x2e   : > { %2189 = vmatpush3.bf16.msra.mxu0 %v2328_v4 }
  0x2f   : > { %2190 = vmatprep.subr.bf16.mxu0 %v2498_v1 }
  0x30   : > { %v2335_v48 = vld [vmem:[%s2960_s29 + $0x8] sm:$0xff]   ;;  %v2336_v49 = vld [vmem:[%s2960_s29] sm:$0xff]  }
  0x32   : > { %2191 = vmatpush3.bf16.msra.mxu0 %v2329_v5 }
  0x33   : > { %2192 = vmatprep.subr.bf16.mxu0 %v2498_v1 }
  0x36   : > { %2193 = vmatpush3.bf16.msra.mxu0 %v2330_v6 }
  0x37   : > { %2194 = vmatprep.subr.bf16.mxu0 %v2498_v1 }
  0x3a   : > { %2195 = vmatpush3.bf16.msra.mxu0 %v2331_v7 }
  0x3b   : > { %2196 = vmatprep.subr.bf16.mxu0 %v2498_v1 }
  0x3e   : > { %2197 = vmatpush3.bf16.msra.mxu0 %v2332_v8 }
  0x41   : > { %2199 = vmatmul.mubr.bf16.vlgmr.msra.gmra.mxu0 %v1040_v9 }
 0x101   : > { %v1139_v11 = vpop.f32.mrf.mxu0 }
 0x102   : > { %v1145_v12 = vadd.f32 %v1139_v11, %v1039_v10  ;;  %v2337_v10 = vld [vmem:[%s2920_s14] sm:$0xff]  }
 0x103   : > { %v2200_v13 = vpop.f32.mrf.mxu0 }
 0x104   : > { %1147 = vst.msk [vmem:[#allocation2] sm:$0xff] %vm1037_vm1, %v1145_v12 }
 0x105   : > { %v1142_v14 = vpop.f32.mrf.mxu0 }
 0x107   : > { %v2201_v15 = vpop.f32.mrf.mxu0 }
 0x108   : > { %v2118_v15 = vld [vmem:[%s2964_s12] ss:$0 sm:$0xff] }
 0x10b   : > { %v1151_v16 = vld [vmem:[#allocation2] sm:$0xff] }
 0x10c   : > { %v1154_v17 = vsel %vm1037_vm1, %v1151_v16, 0.0 }
 0x10d   : > { %1155 = vadd.xlane.f32.xlu0 %v1154_v17  ;;  %v2119_v17 = vld [vmem:[%s2919_s13] ss:$0 sm:$0xff] }
 0x196   : > { %v1156_v18 = vpop.xlane.xlu0 %1155 }
 0x197   : > { %v1158_v19 = vmul.f32 0.03125, %v1156_v18 }
 0x199   : > { %v1159_v20 = vsub.f32 %v1151_v16, %v1158_v19 }
 0x19b   : > { %v1160_v21 = vmul.f32 %v1159_v20, %v1159_v20 }
 0x19d   : > { %v1161_v22 = vsel %vm1037_vm1, %v1160_v21, 0.0 }
 0x19e   : > { %1162 = vadd.xlane.f32.xlu0 %v1161_v22  ;;  %v2120_v22 = vld [vmem:[%s2921_s15] ss:$0 sm:$0xff] }
 0x227   : > { %v1163_v25 = vpop.xlane.xlu0 %1162 }
 0x228   : > { %v1164_v26 = vmul.f32 0.03125, %v1163_v25 }
 0x22a   : > { %v1165_v27 = vadd.f32 1e-05, %v1164_v26 }
 0x22c   : > { %2340 = vrsqrt.f32 %v1165_v27 }
 0x239   : > { %v2341_v28 = vpop.eup %2340 }
 0x23a   : > { %v1167_v30 = vmul.f32 %v2341_v28, %v1159_v20 }
 0x23c   : > { %v1174_v32 = vmul.f32 %v2106_v29, %v1167_v30 }
 0x23e   : > { %v1181_v33 = vadd.f32 %v2107_v31, %v1174_v32 }
 0x240   : > { %v1182_v34 = vmax.f32 %v1181_v33, 0.0 }
 0x242   : > { %1183 = vst.msk [vmem:[#allocation8] sm:$0xff] %vm1037_vm1, %v1182_v34  ;;  %v1184_v35 = vpack.c.bf16 %v1182_v34, %v1182_v34  ;;  %v2338_v34 = vld [vmem:[%s2924_s18 + $0x8] sm:$0xff]  }
 0x244   : > { %2207 = vmatmul.mubr.msk.bf16.vlgmr.msra.gmra.mxu1 %vm1037_vm1, %v1184_v35  ;;  %v2339_v35 = vld [vmem:[%s2924_s18] sm:$0xff]  }
 0x245   : > { %2214 = vmatprep.mubr.msk.bf16.mxu1 %vm2499_vm0, %v2498_v1  ;;  %2211 = vmatpush3.bf16.msra.mxu1 %v2335_v48 }
 0x246   : > { %2212 = vmatprep.subr.bf16.mxu1 %v2498_v1 }
 0x249   : > { %2213 = vmatpush3.bf16.msra.mxu1 %v2336_v49 }
 0x24a   : > { %2218 = vmatprep.subr.bf16.mxu1 %v2498_v1 }
 0x304   : > { %v1245_v37 = vpop.f32.mrf.mxu1 }
 0x305   : > { %v1246_v38 = vadd.f32 %v2108_v36, %v1245_v37 }
 0x306   : > { %v2208_v39 = vpop.f32.mrf.mxu1 }
 0x307   : > { %v1253_v40 = vsel %vm1037_vm1, %v1246_v38, 0.0 }
 0x308   : > { %1254 = vadd.xlane.f32.xlu1 %v1253_v40  ;;  %v1248_v41 = vpop.f32.mrf.mxu1  ;;  %v2123_v40 = vld [vmem:[%s2922_s16] ss:$0 sm:$0xff] }
 0x30a   : > { %v2209_v42 = vpop.f32.mrf.mxu1 }
 0x30b   : > { %v2124_v42 = vld [vmem:[%s2923_s17] ss:$0 sm:$0xff] }
 0x391   : > { %v1255_v43 = vpop.xlane.xlu1 %1254 }
 0x392   : > { %v1256_v44 = vmul.f32 0.03125, %v1255_v43 }
 0x394   : > { %v1257_v45 = vsub.f32 %v1246_v38, %v1256_v44 }
 0x396   : > { %v1258_v46 = vmul.f32 %v1257_v45, %v1257_v45 }
 0x398   : > { %v1259_v47 = vsel %vm1037_vm1, %v1258_v46, 0.0  ;;  %v2125_v46 = vld [vmem:[%s2925_s19] ss:$0 sm:$0xff] }
 0x399   : > { %1260 = vadd.xlane.f32.xlu1 %v1259_v47 }
 0x422   : > { %v1261_v50 = vpop.xlane.xlu1 %1260 }
 0x423   : > { %v1262_v51 = vmul.f32 0.03125, %v1261_v50 }
 0x425   : > { %v1263_v52 = vadd.f32 1e-05, %v1262_v51 }
 0x427   : > { %2342 = vrsqrt.f32 %v1263_v52 }
 0x434   : > { %v2343_v53 = vpop.eup %2342 }
 0x435   : > { %v1265_v55 = vmul.f32 %v2343_v53, %v1257_v45 }
 0x437   : > { %v1272_v57 = vmul.f32 %v2112_v54, %v1265_v55 }
 0x439   : > { %v1279_v58 = vadd.f32 %v2113_v56, %v1272_v57 }
 0x43b   : > { %v1280_v59 = vmax.f32 %v1279_v58, 0.0 }
 0x43d   : > { %v1281_v60 = vpack.c.bf16 %v1280_v59, %v1280_v59 }
 0x43f   : > { %2215 = vmatmul.mubr.msk.bf16.vlgmr.msra.gmra.mxu1 %vm1037_vm1, %v1281_v60 }
 0x440   : > { %2220 = vmatprep.mubr.msk.bf16.mxu1 %vm2499_vm0, %v2498_v1  ;;  %2219 = vmatpush3.bf16.msra.mxu1 %v2337_v10 }
 0x441   : > { %2224 = vmatprep.subr.bf16.mxu1 %v2498_v1 }
 0x4ff   : > { %v1342_v62 = vpop.f32.mrf.mxu1 }
 0x500   : > { %v1343_v63 = vadd.f32 %v2114_v61, %v1342_v62  ;;  %v2129_v62 = vld [vmem:[%s2926_s20] ss:$0 sm:$0xff] }
 0x501   : > { %v2216_v0 = vpop.f32.mrf.mxu1 }
 0x502   : > { %v1351_v2 = vsel %vm1350_vm2, %v1343_v63, 0.0  ;;  %v2130_v0 = vld [vmem:[%s2927_s21] ss:$0 sm:$0xff] }
 0x503   : > { %1352 = vadd.xlane.f32.xlu0 %v1351_v2  ;;  %v1345_v3 = vpop.f32.mrf.mxu1 }
 0x505   : > { %v2217_v4 = vpop.f32.mrf.mxu1 }
 0x58c   : > { %v1353_v5 = vpop.xlane.xlu0 %1352 }
 0x58d   : > { %v1355_v6 = vmul.f32 0.0625, %v1353_v5 }
 0x58f   : > { %v1356_v7 = vsub.f32 %v1343_v63, %v1355_v6 }
 0x591   : > { %v1357_v8 = vmul.f32 %v1356_v7, %v1356_v7 }
 0x593   : > { %v1358_v9 = vsel %vm1350_vm2, %v1357_v8, 0.0 }
 0x594   : > { %1359 = vadd.xlane.f32.xlu1 %v1358_v9 }
 0x61d   : > { %v1360_v11 = vpop.xlane.xlu1 %1359 }
 0x61e   : > { %v1361_v12 = vmul.f32 0.0625, %v1360_v11 }
 0x620   : > { %v1362_v13 = vadd.f32 1e-05, %v1361_v12 }
 0x622   : > { %2344 = vrsqrt.f32 %v1362_v13 }
 0x62f   : > { %v2345_v14 = vpop.eup %2344 }
 0x630   : > { %v1364_v16 = vmul.f32 %v2345_v14, %v1356_v7 }
 0x632   : > { %v1371_v18 = vmul.f32 %v2118_v15, %v1364_v16 }
 0x634   : > { %v1378_v19 = vadd.f32 %v2119_v17, %v1371_v18 }
 0x636   : > { %v1379_v20 = vmax.f32 %v1378_v19, 0.0 }
 0x638   : > { %1380 = vst.msk [vmem:[#allocation10] sm:$0xff] %vm1350_vm2, %v1379_v20  ;;  %v1381_v21 = vpack.c.bf16 %v1379_v20, %v1379_v20 }
 0x63a   : > { %2221 = vmatmul.mubr.msk.bf16.vlgmr.msra.gmra.mxu1 %vm1350_vm2, %v1381_v21 }
 0x63b   : > { %2228 = vmatprep.mubr.msk.bf16.mxu1 %vm2499_vm0, %v2498_v1  ;;  %2225 = vmatpush3.bf16.msra.mxu1 %v2338_v34 }
 0x63c   : > { %2226 = vmatprep.subr.bf16.mxu1 %v2498_v1 }
 0x63f   : > { %2227 = vmatpush3.bf16.msra.mxu1 %v2339_v35 }
 0x6fa   : > { %v1434_v23 = vpop.f32.mrf.mxu1 }
 0x6fb   : > { %v1435_v24 = vadd.f32 %v2120_v22, %v1434_v23 }
 0x6fc   : > { %v2222_v25 = vpop.f32.mrf.mxu1 }
 0x6fd   : > { %v1442_v26 = vsel %vm1037_vm1, %v1435_v24, 0.0 }
 0x6fe   : > { %1443 = vadd.xlane.f32.xlu0 %v1442_v26  ;;  %v1437_v27 = vpop.f32.mrf.mxu1 }
 0x700   : > { %v2223_v28 = vpop.f32.mrf.mxu1 }
 0x787   : > { %v1444_v29 = vpop.xlane.xlu0 %1443 }
 0x788   : > { %v1445_v30 = vmul.f32 0.03125, %v1444_v29 }
 0x78a   : > { %v1446_v31 = vsub.f32 %v1435_v24, %v1445_v30 }
 0x78c   : > { %v1447_v32 = vmul.f32 %v1446_v31, %v1446_v31 }
 0x78e   : > { %v1448_v33 = vsel %vm1037_vm1, %v1447_v32, 0.0 }
 0x78f   : > { %1449 = vadd.xlane.f32.xlu1 %v1448_v33 }
 0x818   : > { %v1450_v36 = vpop.xlane.xlu1 %1449 }
 0x819   : > { %v1451_v37 = vmul.f32 0.03125, %v1450_v36 }
 0x81b   : > { %v1452_v38 = vadd.f32 1e-05, %v1451_v37 }
 0x81d   : > { %2346 = vrsqrt.f32 %v1452_v38 }
 0x82a   : > { %v2347_v39 = vpop.eup %2346 }
 0x82b   : > { %v1454_v41 = vmul.f32 %v2347_v39, %v1446_v31 }
 0x82d   : > { %v1461_v43 = vmul.f32 %v2123_v40, %v1454_v41 }
 0x82f   : > { %v1468_v44 = vadd.f32 %v2124_v42, %v1461_v43 }
 0x831   : > { %v1469_v45 = vmax.f32 %v1468_v44, 0.0 }
 0x833   : > { %v1470_v1 = vpack.c.bf16 %v1469_v45, %v1469_v45 }
 0x835   : > { %1472 = vst.msk [vmem:[#allocation4] sm:$0xf] %vm1471_vm3, %v1470_v1  ;;  %2229 = vmatmul.mubr.msk.bf16.vlgmr.msra.gmra.mxu1 %vm1037_vm1, %v1470_v1 }
 0x8f5   : > { %v1533_v47 = vpop.f32.mrf.mxu1 }
 0x8f6   : > { %v1534_v48 = vadd.f32 %v2125_v46, %v1533_v47 }
 0x8f7   : > { %v2230_v49 = vpop.f32.mrf.mxu1 }
 0x8f8   : > { %v1541_v50 = vsel %vm1037_vm1, %v1534_v48, 0.0 }
 0x8f9   : > { %1542 = vadd.xlane.f32.xlu0 %v1541_v50  ;;  %v1536_v51 = vpop.f32.mrf.mxu1 }
 0x8fb   : > { %v2231_v52 = vpop.f32.mrf.mxu1 }
 0x982   : > { %v1543_v53 = vpop.xlane.xlu0 %1542 }
 0x983   : > { %v1544_v54 = vmul.f32 0.03125, %v1543_v53 }
 0x985   : > { %v1545_v55 = vsub.f32 %v1534_v48, %v1544_v54 }
 0x987   : > { %v1546_v56 = vmul.f32 %v1545_v55, %v1545_v55 }
 0x989   : > { %v1547_v57 = vsel %vm1037_vm1, %v1546_v56, 0.0 }
 0x98a   : > { %1548 = vadd.xlane.f32.xlu1 %v1547_v57 }
 0xa13   : > { %v1549_v58 = vpop.xlane.xlu1 %1548 }
 0xa14   : > { %v1550_v59 = vmul.f32 0.03125, %v1549_v58 }
 0xa16   : > { %v1551_v60 = vadd.f32 1e-05, %v1550_v59 }
 0xa18   : > { %2348 = vrsqrt.f32 %v1551_v60 }
 0xa25   : > { %v2349_v61 = vpop.eup %2348 }
 0xa26   : > { %v1553_v63 = vmul.f32 %v2349_v61, %v1545_v55 }
 0xa28   : > { %v1560_v2 = vmul.f32 %v2129_v62, %v1553_v63 }
 0xa2a   : > { %v1567_v3 = vadd.f32 %v2130_v0, %v1560_v2 }
 0xa2c   : > { %v1568_v4 = vmax.f32 %v1567_v3, 0.0 }
 0xa2e   : > { %v1569_v5 = vpack.c.bf16 %v1568_v4, %v1568_v4 }
 0xa30   : > { %1570 = vst.msk [vmem:[#allocation3] sm:$0xf] %vm1471_vm3, %v1569_v5 }
 0xa31 PF: > { %p2131_p5 = scmp.ne.s32.totalorder %s2488_s7, 1 }
 0xa32   : > { %s2965_s0 = sld [smem:[#allocation19_spill]] (!%p2131_p5) }
 0xa33   : > { %1574 = sbr.rel (%p2131_p5) target bundleno = 3266 (0xcc2), region = 132  ;;  %s2966_s10 = sld [smem:[#allocation20_spill]] (!%p2131_p5) }
 0xa38   : > { %vm1579_vm4 = vcmask 7168   ;;  %v2500_v6 = vmov 0.0   ;;  %v2351_v7 = vld [vmem:[%s2965_s0 + $0x8] sm:$0xff]   ;;  %vm2501_vm5 = vmmov 0   ;;  %v2352_v8 = vld [vmem:[%s2965_s0] sm:$0xff]   ;;  %vm1599_vm6 = vcmask 261120  }
 0xa39   : > { %1581 = vst.msk [vmem:[#allocation6] sm:$0xff] %vm1579_vm4, %v2500_v6  ;;  %2232 = vmatprep.subr.bf16.mxu0 %v2500_v6  ;;  %2236 = vmatprep.mubr.msk.bf16.mxu0 %vm2501_vm5, %v2500_v6  ;;  %v1582_v9 = vld [vmem:[#allocation3] sm:$0xf]  ;;  %v1643_v10 = vlaneseq  ;;  %v2502_v16 = vmov -1e+30   ;;  %v2503_v18 = vmov 0  }
 0xa3a   : > { %2233 = vmatpush3.bf16.msra.mxu0 %v2351_v7  ;;  %1580 = vst.msk [vmem:[#allocation5] sm:$0xff] %vm1579_vm4, %v2502_v16  ;;  %2350 = vset.pattern.permute.xlu0 %v2503_v18  ;;  %v1678_v34 = vld [vmem:[%s2966_s10] sm:$0xff] }
 0xa3b   : > { %2234 = vmatprep.subr.bf16.mxu0 %v2500_v6  ;;  %v1644_v11 = vand.u32 127, %v1643_v10 }
 0xa3d   : > { %vm1648_vm7 = vcmp.lt.s32.totalorder %v1644_v11, 24 }
 0xa3e   : > { %2235 = vmatpush3.bf16.msra.mxu0 %v2352_v8 }
 0xa40   : > { %v1656_v29 = vld [vmem:[#allocation6] sm:$0xff] }
 0xa41   : > { %2237 = vmatmul.mubr.msk.bf16.vlgmr.msra.gmra.mxu0 %vm1599_vm6, %v1582_v9  ;;  %v1652_v19 = vld [vmem:[#allocation5] sm:$0xff] }
 0xb01   : > { %v1637_v12 = vpop.f32.mrf.mxu0 }
 0xb02   : > { %v1651_v13 = vsel %vm1648_vm7, %v1637_v12, -1e+30 }
 0xb03   : > { %1653 = vmax.xlane.f32.xlu0 %v1651_v13  ;;  %v2238_v14 = vpop.f32.mrf.mxu0 }
 0xb05   : > { %v1640_v15 = vpop.f32.mrf.mxu0 }
 0xb07   : > { %v2239_v17 = vpop.f32.mrf.mxu0 }
 0xb8c   : > { %v1654_v20 = vpop.xlane.xlu0 %1653 }
 0xb8d   : > { %v1655_v21 = vmax.f32 %v1652_v19, %v1654_v20 }
 0xb8f   : > { %v1657_v22 = vsub.f32 %v1652_v19, %v1655_v21  ;;  %1674 = vst.msk [vmem:[#allocation5] sm:$0xff] %vm1579_vm4, %v1655_v21  ;;  %1663 = vperm.xlu0 %2350, %v1655_v21  }
 0xb91   : > { %v1658_v27 = vmul.f32 1.442695, %v1657_v22 }
 0xc0a   : > { %v1664_v23 = vpop.permute.xlu0 %1663 }
 0xc0b   : > { %v1666_v24 = vsub.f32 %v1651_v13, %v1664_v23 }
 0xc0d   : > { %v1667_v25 = vmul.f32 1.442695, %v1666_v24 }
 0xc0f   : > { %2353 = vpow2.f32 %v1667_v25 }
 0xc10   : > { %2355 = vpow2.f32 %v1658_v27 }
 0xc1c   : > { %v2354_v26 = vpop.eup %2353 }
 0xc1d   : > { %1669 = vadd.xlane.f32.xlu1 %v2354_v26  ;;  %v2356_v28 = vpop.eup %2355 }
 0xc1e   : > { %v1660_v30 = vmul.f32 %v2356_v28, %v1656_v29 }
 0xca6   : > { %v1670_v31 = vpop.xlane.xlu1 %1669 }
 0xca7   : > { %v1671_v32 = vadd.f32 %v1670_v31, %v1660_v30 }
 0xca9   : > { %1673 = vst.msk [vmem:[#allocation6] sm:$0xff] %vm1579_vm4, %v1671_v32 }
 0xcb0   : > { %v1679_v33 = vld [vmem:[#allocation6] sm:$0xff] }
 0xcb1   : > { %2357 = vrcp.f32 %v1679_v33 }
 0xcbe   : > { %v2358_v35 = vpop.eup %2357 }
 0xcbf   : > { %v1681_v36 = vmul.f32 %v2358_v35, %v1678_v34 }
 0xcc1   : > { %1682 = vst.msk [vmem:[#allocation7] sm:$0xff] %vm1579_vm4, %v1681_v36 }
 0xcc2 PF: > { %p2135_p6 = scmp.ne.s32.totalorder %s2488_s7, 2 }
 0xcc3   : > { %s2967_s9 = sld [smem:[#allocation19_spill]] (!%p2135_p6) }
 0xcc4   : > { %1686 = sbr.rel (%p2135_p6) target bundleno = 3496 (0xda8), region = 144 }
 0xcc9   : > { %v2360_v37 = vld [vmem:[%s2967_s9 + $0x8] sm:$0xff]   ;;  %v2504_v38 = vmov 0.0   ;;  %v2361_v39 = vld [vmem:[%s2967_s9] sm:$0xff]   ;;  %vm2505_vm8 = vmmov 0   ;;  %v1748_v42 = vld [vmem:[#allocation5] sm:$0xff]  ;;  %v2506_v43 = vmov 0  }
 0xcca   : > { %2240 = vmatprep.subr.bf16.mxu0 %v2504_v38  ;;  %2248 = vmatprep.subr.bf16.mxu1 %v2504_v38  ;;  %v2362_v40 = vld [vmem:[%s2928_s22 + $0x8] sm:$0xff]   ;;  %v2363_v41 = vld [vmem:[%s2928_s22] sm:$0xff]   ;;  %vm1704_vm9 = vcmask 261120  }
 0xccb   : > { %2241 = vmatpush3.bf16.msra.mxu0 %v2360_v37  ;;  %2244 = vmatprep.mubr.msk.bf16.mxu0 %vm2505_vm8, %v2504_v38  ;;  %v1687_v44 = vld [vmem:[#allocation3] sm:$0xf]  ;;  %v1757_v45 = vld [vmem:[#allocation7] sm:$0xff]  ;;  %v1765_v1 = vld [vmem:[#allocation4] sm:$0xf] }
 0xccc   : > { %2242 = vmatprep.subr.bf16.mxu0 %v2504_v38  ;;  %2252 = vmatprep.mubr.msk.bf16.mxu1 %vm2505_vm8, %v2504_v38  ;;  %v2139_v48 = vld [vmem:[%s2929_s23] ss:$0 sm:$0xff] }
 0xccd   : > { %2249 = vmatpush3.bf16.msra.mxu1 %v2362_v40  ;;  %2359 = vset.pattern.permute.xlu0 %v2506_v43 }
 0xcce   : > { %2250 = vmatprep.subr.bf16.mxu1 %v2504_v38  ;;  %1751 = vperm.xlu0 %2359, %v1748_v42  }
 0xccf   : > { %2243 = vmatpush3.bf16.msra.mxu0 %v2361_v39 }
 0xcd1   : > { %2251 = vmatpush3.bf16.msra.mxu1 %v2363_v41 }
 0xcd2   : > { %2245 = vmatmul.mubr.msk.bf16.vlgmr.msra.gmra.mxu0 %vm1704_vm9, %v1687_v44  ;;  %1760 = vperm.xlu0 %2359, %v1757_v45  }
 0xcd4   : > { %2253 = vmatmul.mubr.msk.bf16.vlgmr.msra.gmra.mxu1 %vm1704_vm9, %v1765_v1 }
 0xd49   : > { %v1752_v46 = vpop.permute.xlu0 %1751 }
 0xd4d   : > { %v1761_v60 = vpop.permute.xlu0 %1760 }
 0xd92   : > { %v1742_v47 = vpop.f32.mrf.mxu0 }
 0xd93   : > { %v1754_v49 = vsub.f32 %v1742_v47, %v1752_v46 }
 0xd94   : > { %v2246_v50 = vpop.f32.mrf.mxu0  ;;  %v1826_v51 = vpop.f32.mrf.mxu1 }
 0xd95   : > { %v1755_v52 = vmul.f32 1.442695, %v1754_v49  ;;  %v1827_v53 = vadd.f32 %v2139_v48, %v1826_v51 }
 0xd96   : > { %v1745_v54 = vpop.f32.mrf.mxu0  ;;  %v2254_v55 = vpop.f32.mrf.mxu1 }
 0xd97   : > { %2364 = vpow2.f32 %v1755_v52  ;;  %1832 = vst [vmem:[#allocation13] sm:$0xff] %v1827_v53 }
 0xd98   : > { %v2247_v56 = vpop.f32.mrf.mxu0  ;;  %v1829_v57 = vpop.f32.mrf.mxu1 }
 0xd9a   : > { %v2255_v58 = vpop.f32.mrf.mxu1 }
 0xda4   : > { %v2365_v59 = vpop.eup %2364 }
 0xda5   : > { %v1763_v61 = vmul.f32 %v2365_v59, %v1761_v60 }
 0xda7   : > { %1764 = vst [vmem:[#allocation12] sm:$0xff] %v1763_v61 }
 0xda8 PF: > { %s2968_s28 = sadd.s32 4294967295, %s2496_s8   ;;  %s2507_s6 = smov [#allocation8]  }
 0xda9   : > { %p2843_p7 = scmp.eq.s32.totalorder %s2968_s28, 2  ;;  %s2970_s0 = smov %s2968_s28 }
 0xdaa   : > { %s2849_s1 = sand.u32 1, %s2970_s0   ;;  %s1852_s30 = sshll.u32 %s2507_s6, 4  ;;  %s1853_s30 = int_to_ptr.vmem [resolvable:$true] %s1852_s30 }
 0xdab   : > { %s2366_s7 = scalar_lea.vmem %s1853_s30, 128  ;;  %p2373_p11 = scmp.lt.s32.totalorder %s1853_s30, %s1853_s30 }
 0xdac   : > { %p2367_p8 = scmp.ne.s32.totalorder %s1853_s30, %s2366_s7  ;;  %p2374_p12 = scmp.lt.s32.totalorder %s2366_s7, %s2366_s7 }
 0xdae   : > { %p2368_p9 = pnand %p2367_p8, %p2843_p7  ;;  %p2375_p13 = por %p2374_p12, %p2373_p11 }
 0xdb0   : > { %p2369_p10 = pneg %p2368_p9 }
 0xdb2   : > { %p2376_p0 = pnand %p2375_p13, %p2369_p10 }
 0xdb4   : > { %2379 = shalt.err (!%p2376_p0)
}
 0xdb5   : > { %2257 = dma.vmem_to_hbm [thread:$0]  (%p2843_p7), %s1853_s30, 128, %s2930_s24, [#allocation9]  }
 0xdb6   : > { %s2508_s3 = smov [#allocation12]   ;;  %s2509_s0 = smov [#allocation10]  }
 0xdb7   : > { %s1881_s28 = sshll.u32 %s2508_s3, 4  ;;  %s1865_s6 = sshll.u32 %s2509_s0, 4  ;;  %s1882_s28 = int_to_ptr.vmem [resolvable:$true] %s1881_s28  ;;  %s1866_s6 = int_to_ptr.vmem [resolvable:$true] %s1865_s6 }
 0xdb8   : > { %s1834_s11 = scalar_lea.sflag [#allocation9], %s2849_s1  ;;  %s2390_s12 = scalar_lea.vmem %s1882_s28, 128 }
 0xdb9   : > { %p2391_p1 = scmp.ne.s32.totalorder %s1882_s28, %s2390_s12  ;;  %s2396_s7 = scalar_lea.vmem %s1882_s28, 256 }
 0xdba   : > { %p2397_p4 = scmp.lt.s32.totalorder %s1882_s28, %s1882_s28  ;;  %p2398_p5 = scmp.lt.s32.totalorder %s2396_s7, %s2390_s12 }
 0xdbb   : > { %p2392_p2 = pnand %p2391_p1, %p2843_p7 }
 0xdbc   : > { %p2399_p6 = por %p2398_p5, %p2397_p4 }
 0xdbd   : > { %p2393_p3 = pneg %p2392_p2 }
 0xdbf   : > { %p2400_p8 = pnand %p2399_p6, %p2393_p3 }
 0xdc1   : > { %2403 = shalt.err (!%p2400_p8)
}
 0xdc2   : > { %2261 = dma.vmem_to_hbm [thread:$0]  (%p2843_p7), %s1882_s28, 128, %s2932_s26, %s1834_s11  }
 0xdc3   : > { %s2414_s10 = scalar_lea.vmem %s1866_s6, 128  ;;  %p2421_p12 = scmp.lt.s32.totalorder %s1866_s6, %s1866_s6 }
 0xdc4   : > { %p2415_p9 = scmp.ne.s32.totalorder %s1866_s6, %s2414_s10  ;;  %p2422_p13 = scmp.lt.s32.totalorder %s2414_s10, %s2414_s10 }
 0xdc6   : > { %p2416_p10 = pnand %p2415_p9, %p2843_p7  ;;  %p2423_p0 = por %p2422_p13, %p2421_p12 }
 0xdc8   : > { %p2417_p11 = pneg %p2416_p10 }
 0xdca   : > { %p2424_p1 = pnand %p2423_p0, %p2417_p11 }
 0xdcc   : > { %2427 = shalt.err (!%p2424_p1)
}
 0xdcd   : > { %2259 = dma.vmem_to_hbm [thread:$0]  (%p2843_p7), %s1866_s6, 128, %s2931_s25, [#allocation11]  }
 0xdce   : > { %s2510_s0 = smov [#allocation13]  }
 0xdcf   : > { %s1897_s28 = sshll.u32 %s2510_s0, 4  ;;  %s1898_s28 = int_to_ptr.vmem [resolvable:$true] %s1897_s28 }
 0xdd0   : > { %s2438_s7 = scalar_lea.vmem %s1898_s28, 128  ;;  %s2444_s30 = scalar_lea.vmem %s1898_s28, 256 }
 0xdd1   : > { %p2439_p2 = scmp.ne.s32.totalorder %s1898_s28, %s2438_s7  ;;  %p2445_p5 = scmp.lt.s32.totalorder %s1898_s28, %s1898_s28 }
 0xdd2   : > { %p2446_p6 = scmp.lt.s32.totalorder %s2444_s30, %s2438_s7 }
 0xdd3   : > { %p2440_p3 = pnand %p2439_p2, %p2843_p7 }
 0xdd4   : > { %p2447_p8 = por %p2446_p6, %p2445_p5 }
 0xdd5   : > { %p2441_p4 = pneg %p2440_p3 }
 0xdd7   : > { %p2448_p9 = pnand %p2447_p8, %p2441_p4 }
 0xdd9   : > { %2451 = shalt.err (!%p2448_p9)
}
 0xdda   : > { %2263 = dma.vmem_to_hbm [thread:$0]  (%p2843_p7), %s1898_s28, 128, %s2933_s27, %s1834_s11  }
 0xddb   : > { %2475 = dma.done.wait (%p2843_p7), [#allocation9], 128  }
 0xddc   : > { %2477 = vsyncadd (%p2843_p7), [#allocation9], 4294967168 }
 0xddd   : > { %2479 = dma.done.wait (%p2843_p7), [#allocation11], 128  }
 0xdde   : > { %2481 = vsyncadd (%p2843_p7), [#allocation11], 4294967168 }
 0xddf PF: > { %p2285_p10 = scmp.ge.s32.totalorder %s2496_s8, 2  ;;  %s2971_s1 = sadd.s32 4294967294, %s2496_s8  }
 0xde0   : > { %p2286_p11 = scmp.eq.s32.totalorder %s2971_s1, 2  ;;  %s2972_s10 = smov %s2971_s1 }
 0xde1   : > { %s1917_s11 = sand.u32 1, %s2972_s10  }
 0xde2   : > { %p2273_p12 = pnand %p2286_p11, %p2285_p10  ;;  %s1918_s12 = scalar_lea.sflag [#allocation9], %s1917_s11 }
 0xde4   : > { %p2274_p13 = pneg %p2273_p12 }
 0xde6   : > { %2483 = dma.done.wait (%p2274_p13), %s1918_s12, 256  }
 0xde7   : > { %2485 = vsyncadd (%p2274_p13), %s1918_s12, 4294967040  ;;  %s40_s8 = sadd.s32 1, %s2496_s8   ;;  %s2973_s7 = smov %s2492_s4 }
 0xde8   : > { %p37_p0 = scmp.ge.s32.totalorder %s40_s8, 5   ;;  %s2974_s4 = smov %s2976_s5 }
 0xdea   :  { %39 = sbr.rel (!%p37_p0) target bundleno = 17 (0x11), region = 226 }
 0xdef   :  { %1932 = vsyncpa [#allocation9], 1 }
 0xdf0   :  { %1934 = vsyncpa [#allocation9 + $0x1], 1 }
 0xdf1   :  { %1935 = vsyncpa [#allocation11], 1 }

</bundles_post_ra>
